<compile_context>
chip_gen: v6e
topology: v6e:2x2x1
jax: 0.10.0
libtpu: 0.0.40
codegen_flags: <defaults>
</compile_context>

<pallas_src>
import jax
import jax.numpy as jnp
from jax.experimental import pallas as pl
from jax.experimental.pallas import tpu as pltpu

NZ = 128
H1 = 256
H2 = 512
OUT = 784            # 28 * 28 true output width

_TILE_B_MAX = 1024   # per-step batch tile cap (~20 MiB VMEM incl. f32 temps)


def _generator_kernel(x_ref, w1_ref, b1_ref, w2_ref, b2_ref, w3_ref, b3_ref,
                      o_ref):
    # Layer 1: Linear(128, 256) + ReLU.  bf16 operands -> f32 MXU accumulate;
    # bias/activation epilogue in f32 (portable: v5e has no bf16 VPU/EUP).
    h1 = jnp.dot(x_ref[...], w1_ref[...], preferred_element_type=jnp.float32)
    h1 = jnp.maximum(h1 + b1_ref[...], 0.0)
    # Layer 2: Linear(256, 512) + ReLU
    h2 = jnp.dot(h1.astype(jnp.bfloat16), w2_ref[...],
                 preferred_element_type=jnp.float32)
    h2 = jnp.maximum(h2 + b2_ref[...], 0.0)
    # Layer 3: Linear(512, 784) + Tanh, stored directly at the true 784 width
    # so the wrapper needs no extra [:, :784] HBM pass.
    h3 = jnp.dot(h2.astype(jnp.bfloat16), w3_ref[...],
                 preferred_element_type=jnp.float32)
    o_ref[...] = jnp.tanh(h3 + b3_ref[...]).astype(o_ref.dtype)


def _round_up(x, m):
    return -(-x // m) * m


def _pick_tile_b(batch):
    """Batch tile: multiple of 16 (bf16 sublane granule); >= 2 grid steps when
    the batch is big enough so ("parallel",) gives both v7x TensorCores work;
    capped at _TILE_B_MAX so double-buffered x/out tiles + f32 intermediates
    stay well inside the 48 MiB scoped-VMEM budget on every generation."""
    b16 = _round_up(batch, 16)
    if b16 <= 32:                         # nothing useful to split
        return b16
    half = _round_up(-(-b16 // 2), 16)    # ~half the batch -> >= 2 tiles
    return min(_TILE_B_MAX, half)


def generator_forward(x, packed_params):
    """x: (B, 128) float32 -> (B, 1, 28, 28) float32 (same as .view(-1,1,28,28))."""
    w1, b1, w2, b2, w3, b3 = packed_params
    B = x.shape[0]

    tb = _pick_tile_b(B)
    b_pad = _round_up(B, tb)

    x_p = x.astype(jnp.bfloat16)
    if b_pad != B:
        x_p = jnp.pad(x_p, ((0, b_pad - B), (0, 0)))

    grid = (b_pad // tb,)

    # Weights/biases: constant index_map -> fetched once and kept VMEM-resident
    # across all batch tiles; only the x / out tiles stream (double-buffered).
    # (Default 2-deep buffering on the residents costs ~1.2 MiB extra VMEM,
    # negligible against the 48 MiB budget, so we keep the defaults.)
    def resident(a):
        return pl.BlockSpec(a.shape, lambda i: (0,) * a.ndim)

    flops = 2 * b_pad * (NZ * H1 + H1 * H2 + H2 * OUT)
    bytes_accessed = (
        x_p.size * 2                              # bf16 input
        + (w1.size + w2.size + w3.size) * 2       # bf16 weights
        + (b1.size + b2.size + b3.size) * 4       # f32 biases
        + b_pad * OUT * 4                         # f32 output
    )

    out_flat = pl.pallas_call(
        _generator_kernel,
        out_shape=jax.ShapeDtypeStruct((b_pad, OUT), jnp.float32),
        grid=grid,
        in_specs=[
            pl.BlockSpec((tb, NZ), lambda i: (i, 0)),
            resident(w1), resident(b1),
            resident(w2), resident(b2),
            resident(w3), resident(b3),
        ],
        out_specs=pl.BlockSpec((tb, OUT), lambda i: (i, 0)),
        compiler_params=pltpu.CompilerParams(
            dimension_semantics=("parallel",),        # megacore batch sharding
            vmem_limit_bytes=48 * 1024 * 1024),       # > all default scoped limits
        cost_estimate=pl.CostEstimate(
            flops=flops,
            transcendentals=b_pad * OUT,              # tanh
            bytes_accessed=bytes_accessed),
    )(x_p, w1, b1, w2, b2, w3, b3)

    # Kernel already stored the true 784 width; only drop batch padding.
    if b_pad != B:
        out_flat = out_flat[:B]
    return out_flat.reshape(-1, 1, 28, 28)


def init_params(key):
    """Deterministic f32 init mimicking nn.Linear's U(-1/sqrt(fan_in), +) bounds."""
    ks = jax.random.split(key, 6)

    def linear(kw, kb, fan_in, fan_out):
        bound = 1.0 / jnp.sqrt(jnp.float32(fan_in))
        w = jax.random.uniform(kw, (fan_in, fan_out), jnp.float32,
                               minval=-bound, maxval=bound)
        # Biases kept 2D (1, fan_out) for TPU-friendly layout; broadcast over B.
        b = jax.random.uniform(kb, (1, fan_out), jnp.float32,
                               minval=-bound, maxval=bound)
        return w, b

    w1, b1 = linear(ks[0], ks[1], NZ, H1)
    w2, b2 = linear(ks[2], ks[3], H1, H2)
    w3, b3 = linear(ks[4], ks[5], H2, OUT)
    return (w1, b1, w2, b2, w3, b3)


def pack_params(params):
    """Kernel-side packing: bf16 weights, f32 biases (no output padding needed)."""
    w1, b1, w2, b2, w3, b3 = params
    return (w1.astype(jnp.bfloat16), b1,
            w2.astype(jnp.bfloat16), b2,
            w3.astype(jnp.bfloat16), b3)


if __name__ == "__main__":
    key = jax.random.PRNGKey(0)
    k_param, k_x = jax.random.split(key)

    params = init_params(k_param)
    packed = pack_params(params)

    B = 8  # small batch
    x = jax.random.normal(k_x, (B, NZ), dtype=jnp.float32)

    out = generator_forward(x, packed)
    out = jax.block_until_ready(out)

    assert out.shape == (B, 1, 28, 28), out.shape
    assert out.dtype == jnp.float32

    # Reference 1: same bf16/mixed-precision path in pure JAX (tight tolerance).
    w1b, b1, w2b, b2, w3b, b3 = packed
    xb = x.astype(jnp.bfloat16)
    r = jnp.maximum(jnp.dot(xb, w1b, preferred_element_type=jnp.float32) + b1, 0.0)
    r = jnp.maximum(jnp.dot(r.astype(jnp.bfloat16), w2b,
                            preferred_element_type=jnp.float32) + b2, 0.0)
    r = jnp.tanh(jnp.dot(r.astype(jnp.bfloat16), w3b,
                         preferred_element_type=jnp.float32) + b3)
    ref_bf16 = r.reshape(-1, 1, 28, 28)
    assert jnp.allclose(out, ref_bf16, atol=5e-3, rtol=5e-3)

    # Reference 2: original full-f32 math (loose tolerance — bf16 weight quantization).
    w1, b1f, w2, b2f, w3, b3f = params
    ref_f32 = jnp.maximum(x @ w1 + b1f, 0.0)
    ref_f32 = jnp.maximum(ref_f32 @ w2 + b2f, 0.0)
    ref_f32 = jnp.tanh(ref_f32 @ w3 + b3f).reshape(-1, 1, 28, 28)
    assert jnp.allclose(out, ref_f32, atol=5e-2, rtol=5e-2)

    print("KERNEL_OK")
</pallas_src>

<mosaic_0001>
module attributes {stable_mosaic.version = 11 : i64} {
  func.func @_generator_kernel(%arg0: i32, %arg1: memref<16x128xbf16, #tpu.memory_space<vmem>>, %arg2: memref<128x256xbf16, #tpu.memory_space<vmem>>, %arg3: memref<1x256xf32, #tpu.memory_space<vmem>>, %arg4: memref<256x512xbf16, #tpu.memory_space<vmem>>, %arg5: memref<1x512xf32, #tpu.memory_space<vmem>>, %arg6: memref<512x784xbf16, #tpu.memory_space<vmem>>, %arg7: memref<1x784xf32, #tpu.memory_space<vmem>>, %arg8: memref<16x784xf32, #tpu.memory_space<vmem>>) attributes {dimension_semantics = [#tpu.dimension_semantics<parallel>], iteration_bounds = array<i64: 1>, scalar_prefetch = 0 : i64, scratch_operands = 0 : i64, tpu.core_type = #tpu.core_type<tc>, window_params = [{transform_indices = @transform_0, window_bounds = array<i64: 16, 128>}, {pipeline_mode = #tpu.pipeline_mode<synchronous>, transform_indices = @transform_1, window_bounds = array<i64: 128, 256>}, {pipeline_mode = #tpu.pipeline_mode<synchronous>, transform_indices = @transform_2, window_bounds = array<i64: 1, 256>}, {pipeline_mode = #tpu.pipeline_mode<synchronous>, transform_indices = @transform_3, window_bounds = array<i64: 256, 512>}, {pipeline_mode = #tpu.pipeline_mode<synchronous>, transform_indices = @transform_4, window_bounds = array<i64: 1, 512>}, {pipeline_mode = #tpu.pipeline_mode<synchronous>, transform_indices = @transform_5, window_bounds = array<i64: 512, 784>}, {pipeline_mode = #tpu.pipeline_mode<synchronous>, transform_indices = @transform_6, window_bounds = array<i64: 1, 784>}, {transform_indices = @transform_7, window_bounds = array<i64: 16, 784>}]} {
    %c0 = arith.constant 0 : index
    %c0_0 = arith.constant 0 : index
    %0 = vector.load %arg1[%c0, %c0_0] : memref<16x128xbf16, #tpu.memory_space<vmem>>, vector<16x128xbf16>
    %c0_1 = arith.constant 0 : index
    %c0_2 = arith.constant 0 : index
    %1 = vector.load %arg2[%c0_1, %c0_2] : memref<128x256xbf16, #tpu.memory_space<vmem>>, vector<128x256xbf16>
    %cst = arith.constant dense<0.000000e+00> : vector<16x256xf32>
    %2 = tpu.matmul %0, %1, %cst {dimension_numbers = #tpu.dot_dimension_numbers<[1], [0], [0], [1], [0, 0, 1, 1], [], []>} : vector<16x128xbf16>, vector<128x256xbf16>, vector<16x256xf32> -> vector<16x256xf32>
    %c0_3 = arith.constant 0 : index
    %c0_4 = arith.constant 0 : index
    %3 = vector.load %arg3[%c0_3, %c0_4] : memref<1x256xf32, #tpu.memory_space<vmem>>, vector<1x256xf32>
    %4 = vector.broadcast %3 : vector<1x256xf32> to vector<16x256xf32>
    %5 = arith.addf %2, %4 : vector<16x256xf32>
    %cst_5 = arith.constant 0.000000e+00 : f32
    %6 = vector.broadcast %cst_5 : f32 to vector<16x256xf32>
    %7 = arith.maximumf %5, %6 : vector<16x256xf32>
    %8 = arith.truncf %7 : vector<16x256xf32> to vector<16x256xbf16>
    %c0_6 = arith.constant 0 : index
    %c0_7 = arith.constant 0 : index
    %9 = vector.load %arg4[%c0_6, %c0_7] : memref<256x512xbf16, #tpu.memory_space<vmem>>, vector<256x512xbf16>
    %cst_8 = arith.constant dense<0.000000e+00> : vector<16x512xf32>
    %10 = tpu.matmul %8, %9, %cst_8 {dimension_numbers = #tpu.dot_dimension_numbers<[1], [0], [0], [1], [0, 0, 1, 1], [], []>} : vector<16x256xbf16>, vector<256x512xbf16>, vector<16x512xf32> -> vector<16x512xf32>
    %c0_9 = arith.constant 0 : index
    %c0_10 = arith.constant 0 : index
    %11 = vector.load %arg5[%c0_9, %c0_10] : memref<1x512xf32, #tpu.memory_space<vmem>>, vector<1x512xf32>
    %12 = vector.broadcast %11 : vector<1x512xf32> to vector<16x512xf32>
    %13 = arith.addf %10, %12 : vector<16x512xf32>
    %cst_11 = arith.constant 0.000000e+00 : f32
    %14 = vector.broadcast %cst_11 : f32 to vector<16x512xf32>
    %15 = arith.maximumf %13, %14 : vector<16x512xf32>
    %16 = arith.truncf %15 : vector<16x512xf32> to vector<16x512xbf16>
    %c0_12 = arith.constant 0 : index
    %c0_13 = arith.constant 0 : index
    %17 = vector.load %arg6[%c0_12, %c0_13] : memref<512x784xbf16, #tpu.memory_space<vmem>>, vector<512x784xbf16>
    %cst_14 = arith.constant dense<0.000000e+00> : vector<16x784xf32>
    %18 = tpu.matmul %16, %17, %cst_14 {dimension_numbers = #tpu.dot_dimension_numbers<[1], [0], [0], [1], [0, 0, 1, 1], [], []>} : vector<16x512xbf16>, vector<512x784xbf16>, vector<16x784xf32> -> vector<16x784xf32>
    %c0_15 = arith.constant 0 : index
    %c0_16 = arith.constant 0 : index
    %19 = vector.load %arg7[%c0_15, %c0_16] : memref<1x784xf32, #tpu.memory_space<vmem>>, vector<1x784xf32>
    %20 = vector.broadcast %19 : vector<1x784xf32> to vector<16x784xf32>
    %21 = arith.addf %18, %20 : vector<16x784xf32>
    %22 = math.tanh %21 : vector<16x784xf32>
    %c0_17 = arith.constant 0 : index
    %c0_18 = arith.constant 0 : index
    %23 = vector.load %arg8[%c0_17, %c0_18] : memref<16x784xf32, #tpu.memory_space<vmem>>, vector<16x784xf32>
    tpu.vector_store %arg8[%c0_17, %c0_18], %22 {strides = array<i32>} : memref<16x784xf32, #tpu.memory_space<vmem>>, vector<16x784xf32>,
    return
  }
  func.func @transform_0(%arg0: i32) -> (i32, i32) {
    %c0_i32 = arith.constant 0 : i32
    %c0_i32_0 = arith.constant 0 : i32
    return %arg0, %c0_i32 : i32, i32
  }
  func.func @transform_1(%arg0: i32) -> (i32, i32) {
    %c0_i32 = arith.constant 0 : i32
    %c0_i32_0 = arith.constant 0 : i32
    %c0_i32_1 = arith.constant 0 : i32
    return %c0_i32, %c0_i32_0 : i32, i32
  }
  func.func @transform_2(%arg0: i32) -> (i32, i32) {
    %c0_i32 = arith.constant 0 : i32
    %c0_i32_0 = arith.constant 0 : i32
    %c0_i32_1 = arith.constant 0 : i32
    return %c0_i32, %c0_i32_0 : i32, i32
  }
  func.func @transform_3(%arg0: i32) -> (i32, i32) {
    %c0_i32 = arith.constant 0 : i32
    %c0_i32_0 = arith.constant 0 : i32
    %c0_i32_1 = arith.constant 0 : i32
    return %c0_i32, %c0_i32_0 : i32, i32
  }
  func.func @transform_4(%arg0: i32) -> (i32, i32) {
    %c0_i32 = arith.constant 0 : i32
    %c0_i32_0 = arith.constant 0 : i32
    %c0_i32_1 = arith.constant 0 : i32
    return %c0_i32, %c0_i32_0 : i32, i32
  }
  func.func @transform_5(%arg0: i32) -> (i32, i32) {
    %c0_i32 = arith.constant 0 : i32
    %c0_i32_0 = arith.constant 0 : i32
    %c0_i32_1 = arith.constant 0 : i32
    return %c0_i32, %c0_i32_0 : i32, i32
  }
  func.func @transform_6(%arg0: i32) -> (i32, i32) {
    %c0_i32 = arith.constant 0 : i32
    %c0_i32_0 = arith.constant 0 : i32
    %c0_i32_1 = arith.constant 0 : i32
    return %c0_i32, %c0_i32_0 : i32, i32
  }
  func.func @transform_7(%arg0: i32) -> (i32, i32) {
    %c0_i32 = arith.constant 0 : i32
    %c0_i32_0 = arith.constant 0 : i32
    return %arg0, %c0_i32 : i32, i32
  }
}

</mosaic_0001>

<bundles_post_ra>
// kernel: tpu_custom_call.1
= control target key start
LH: loop header
LB: loop body
LE: loop exit
PB: predicated region body
PF: predicated region fallthrough
CT: control target
= control target key end

     0   :  { %v3371_v2 = vmov 0   ;;  %s4402_s0 = inlined_call_operand.vmem [shape: bf16[16,128], index: 0, kind: input, shape index: {}]   ;;  %s4403_s1 = inlined_call_operand.vmem [shape: bf16[128,256], index: 1, kind: input, shape index: {}]   ;;  %s4404_s2 = inlined_call_operand.vmem [shape: f32[1,256], index: 2, kind: input, shape index: {}]   ;;  %s4405_s3 = inlined_call_operand.vmem [shape: bf16[256,512], index: 3, kind: input, shape index: {}]   ;;  %s4406_s4 = inlined_call_operand.vmem [shape: f32[1,512], index: 4, kind: input, shape index: {}]   ;;  %s4407_s5 = inlined_call_operand.vmem [shape: bf16[512,784], index: 5, kind: input, shape index: {}]   ;;  %s4408_s6 = inlined_call_operand.vmem [shape: f32[1,784], index: 6, kind: input, shape index: {}]   ;;  %s4409_s7 = inlined_call_operand.hbm [shape: f32[16,784], index: 7, kind: output, shape index: {}]  }
   0x1   :  { %v2880_v0 = vld [vmem:[%s4403_s1 + $0x74] ss:$8 sps:$4 sm:$0xff]   ;;  %v2882_v1 = vld [vmem:[%s4403_s1 + $0x70] ss:$8 sps:$4 sm:$0xff]   ;;  %176 = vmatprep.mubr.bf16.mxu0 %v3371_v2  ;;  %v2883_v3 = vld [vmem:[%s4403_s1 + $0x64] ss:$8 sps:$4 sm:$0xff]  }
   0x2   :  { %144 = vmatprep.subr.bf16.mxu0 %v2880_v0  ;;  %v2885_v4 = vld [vmem:[%s4403_s1 + $0x60] ss:$8 sps:$4 sm:$0xff]   ;;  %v2886_v5 = vld [vmem:[%s4403_s1 + $0x54] ss:$8 sps:$4 sm:$0xff]   ;;  %v2888_v6 = vld [vmem:[%s4403_s1 + $0x50] ss:$8 sps:$4 sm:$0xff]  }
   0x3   :  { %145 = vmatpush1.bf16.msra.mxu0 %v2882_v1  ;;  %v2889_v7 = vld [vmem:[%s4403_s1 + $0x44] ss:$8 sps:$4 sm:$0xff]   ;;  %v2891_v8 = vld [vmem:[%s4403_s1 + $0x40] ss:$8 sps:$4 sm:$0xff]   ;;  %v2892_v9 = vld [vmem:[%s4403_s1 + $0x34] ss:$8 sps:$4 sm:$0xff]  }
   0x4   :  { %146 = vmatprep.subr.bf16.mxu0 %v2883_v3  ;;  %v2905_v10 = vld [vmem:[%s4405_s3 + $0xe4] ss:$16 sps:$4 sm:$0xff]   ;;  %v2894_v11 = vld [vmem:[%s4403_s1 + $0x30] ss:$8 sps:$4 sm:$0xff]   ;;  %v2897_v17 = vld [vmem:[%s4403_s1 + $0x20] ss:$8 sps:$4 sm:$0xff]  }
   0x5   :  { %599 = vmatprep.subr.bf16.mxu1 %v2905_v10  ;;  %v2910_v12 = vld [vmem:[%s4405_s3 + $0xe0] ss:$16 sps:$4 sm:$0xff]   ;;  %v2911_v13 = vld [vmem:[%s4405_s3 + $0xc4] ss:$16 sps:$4 sm:$0xff]   ;;  %v2909_v26 = vld [vmem:[%s4405_s3 + $0xec] ss:$16 sps:$4 sm:$0xff]  }
   0x6   :  { %v2895_v14 = vld [vmem:[%s4403_s1 + $0x24] ss:$8 sps:$4 sm:$0xff]   ;;  %600 = vmatpush1.bf16.msra.mxu1 %v2910_v12  ;;  %v2916_v15 = vld [vmem:[%s4405_s3 + $0xc0] ss:$16 sps:$4 sm:$0xff]   ;;  %v2898_v18 = vld [vmem:[%s4403_s1 + $0x14] ss:$8 sps:$4 sm:$0xff]  }
   0x7   :  { %147 = vmatpush1.bf16.msra.mxu0 %v2885_v4  ;;  %601 = vmatprep.subr.bf16.mxu1 %v2911_v13  ;;  %v2917_v16 = vld [vmem:[%s4405_s3 + $0xa4] ss:$16 sps:$4 sm:$0xff]   ;;  %v2922_v19 = vld [vmem:[%s4405_s3 + $0xa0] ss:$16 sps:$4 sm:$0xff]   ;;  %v2907_v30 = vld [vmem:[%s4405_s3 + $0xe8] ss:$16 sps:$4 sm:$0xff]  }
   0x8   :  { %148 = vmatprep.subr.bf16.mxu0 %v2886_v5  ;;  %v2923_v20 = vld [vmem:[%s4405_s3 + $0x84] ss:$16 sps:$4 sm:$0xff]   ;;  %v2900_v21 = vld [vmem:[%s4403_s1 + $0x10] ss:$8 sps:$4 sm:$0xff]   ;;  %v2903_v25 = vld [vmem:[%s4403_s1] ss:$8 sps:$4 sm:$0xff]  }
   0x9   :  { %v2901_v22 = vld [vmem:[%s4403_s1 + $0x4] ss:$8 sps:$4 sm:$0xff]   ;;  %v2928_v23 = vld [vmem:[%s4405_s3 + $0x80] ss:$16 sps:$4 sm:$0xff]   ;;  %v2913_v34 = vld [vmem:[%s4405_s3 + $0xc8] ss:$16 sps:$4 sm:$0xff]  }
   0xa   :  { %602 = vmatpush1.bf16.msra.mxu1 %v2916_v15  ;;  %v2929_v24 = vld [vmem:[%s4405_s3 + $0x64] ss:$16 sps:$4 sm:$0xff]   ;;  %v2934_v27 = vld [vmem:[%s4405_s3 + $0x60] ss:$16 sps:$4 sm:$0xff]   ;;  %v2915_v31 = vld [vmem:[%s4405_s3 + $0xcc] ss:$16 sps:$4 sm:$0xff]  }
   0xb   :  { %149 = vmatpush1.bf16.msra.mxu0 %v2888_v6  ;;  %603 = vmatprep.subr.bf16.mxu1 %v2917_v16  ;;  %v2935_v28 = vld [vmem:[%s4405_s3 + $0x44] ss:$16 sps:$4 sm:$0xff]   ;;  %v2940_v32 = vld [vmem:[%s4405_s3 + $0x40] ss:$16 sps:$4 sm:$0xff]   ;;  %v2921_v35 = vld [vmem:[%s4405_s3 + $0xac] ss:$16 sps:$4 sm:$0xff]  }
   0xc   :  { %150 = vmatprep.subr.bf16.mxu0 %v2889_v7  ;;  %v2904_v29 = vld [vmem:[%s4402_s0] sm:$0xff]   ;;  %v2919_v38 = vld [vmem:[%s4405_s3 + $0xa8] ss:$16 sps:$4 sm:$0xff]   ;;  %v2927_v39 = vld [vmem:[%s4405_s3 + $0x8c] ss:$16 sps:$4 sm:$0xff]  }
   0xd   :  { %v2941_v33 = vld [vmem:[%s4405_s3 + $0x24] ss:$16 sps:$4 sm:$0xff]   ;;  %v2946_v36 = vld [vmem:[%s4405_s3 + $0x20] ss:$16 sps:$4 sm:$0xff]   ;;  %v2925_v42 = vld [vmem:[%s4405_s3 + $0x88] ss:$16 sps:$4 sm:$0xff]  }
   0xe   :  { %604 = vmatpush1.bf16.msra.mxu1 %v2922_v19  ;;  %v2947_v37 = vld [vmem:[%s4405_s3 + $0x4] ss:$16 sps:$4 sm:$0xff]   ;;  %v2952_v40 = vld [vmem:[%s4405_s3] ss:$16 sps:$4 sm:$0xff]   ;;  %v2933_v43 = vld [vmem:[%s4405_s3 + $0x6c] ss:$16 sps:$4 sm:$0xff]  }
   0xf   :  { %151 = vmatpush1.bf16.msra.mxu0 %v2891_v8  ;;  %605 = vmatprep.subr.bf16.mxu1 %v2923_v20  ;;  %v2953_v41 = vld [vmem:[%s4405_s3 + $0x1e4] ss:$16 sps:$4 sm:$0xff]   ;;  %v2958_v44 = vld [vmem:[%s4405_s3 + $0x1e0] ss:$16 sps:$4 sm:$0xff]   ;;  %v2931_v45 = vld [vmem:[%s4405_s3 + $0x68] ss:$16 sps:$4 sm:$0xff]  }
  0x10   :  { %152 = vmatprep.subr.bf16.mxu0 %v2892_v9  ;;  %v2959_v46 = vld [vmem:[%s4405_s3 + $0x1c4] ss:$16 sps:$4 sm:$0xff]   ;;  %v2939_v47 = vld [vmem:[%s4405_s3 + $0x4c] ss:$16 sps:$4 sm:$0xff]   ;;  %v2964_v48 = vld [vmem:[%s4405_s3 + $0x1c0] ss:$16 sps:$4 sm:$0xff]  }
  0x11   :  { %v2965_v49 = vld [vmem:[%s4405_s3 + $0x1a4] ss:$16 sps:$4 sm:$0xff]   ;;  %v2937_v50 = vld [vmem:[%s4405_s3 + $0x48] ss:$16 sps:$4 sm:$0xff]   ;;  %v2945_v51 = vld [vmem:[%s4405_s3 + $0x2c] ss:$16 sps:$4 sm:$0xff]  }
  0x12   :  { %606 = vmatpush1.bf16.msra.mxu1 %v2928_v23  ;;  %v2970_v52 = vld [vmem:[%s4405_s3 + $0x1a0] ss:$16 sps:$4 sm:$0xff]   ;;  %v2971_v53 = vld [vmem:[%s4405_s3 + $0x184] ss:$16 sps:$4 sm:$0xff]   ;;  %v2943_v54 = vld [vmem:[%s4405_s3 + $0x28] ss:$16 sps:$4 sm:$0xff]  }
  0x13   :  { %153 = vmatpush1.bf16.msra.mxu0 %v2894_v11  ;;  %607 = vmatprep.subr.bf16.mxu1 %v2929_v24  ;;  %v2951_v55 = vld [vmem:[%s4405_s3 + $0xc] ss:$16 sps:$4 sm:$0xff]   ;;  %v2976_v56 = vld [vmem:[%s4405_s3 + $0x180] ss:$16 sps:$4 sm:$0xff]   ;;  %v2977_v57 = vld [vmem:[%s4405_s3 + $0x164] ss:$16 sps:$4 sm:$0xff]  }
  0x14   :  { %154 = vmatprep.subr.bf16.mxu0 %v2895_v14  ;;  %v2949_v58 = vld [vmem:[%s4405_s3 + $0x8] ss:$16 sps:$4 sm:$0xff]   ;;  %v2957_v59 = vld [vmem:[%s4405_s3 + $0x1ec] ss:$16 sps:$4 sm:$0xff]   ;;  %v2982_v60 = vld [vmem:[%s4405_s3 + $0x160] ss:$16 sps:$4 sm:$0xff]  }
  0x15   :  { %v2955_v61 = vld [vmem:[%s4405_s3 + $0x1e8] ss:$16 sps:$4 sm:$0xff]   ;;  %v2963_v62 = vld [vmem:[%s4405_s3 + $0x1cc] ss:$16 sps:$4 sm:$0xff]   ;;  %v2983_v6 = vld [vmem:[%s4405_s3 + $0x144] ss:$16 sps:$4 sm:$0xff]  }
  0x16   :  { %608 = vmatpush1.bf16.msra.mxu1 %v2934_v27  ;;  %v2961_v63 = vld [vmem:[%s4405_s3 + $0x1c8] ss:$16 sps:$4 sm:$0xff]   ;;  %v2969_v0 = vld [vmem:[%s4405_s3 + $0x1ac] ss:$16 sps:$4 sm:$0xff]   ;;  %v2988_v9 = vld [vmem:[%s4405_s3 + $0x140] ss:$16 sps:$4 sm:$0xff]  }
  0x17   :  { %155 = vmatpush1.bf16.msra.mxu0 %v2897_v17  ;;  %609 = vmatprep.subr.bf16.mxu1 %v2935_v28  ;;  %v2967_v1 = vld [vmem:[%s4405_s3 + $0x1a8] ss:$16 sps:$4 sm:$0xff]   ;;  %v2975_v2 = vld [vmem:[%s4405_s3 + $0x18c] ss:$16 sps:$4 sm:$0xff]   ;;  %v2989_v10 = vld [vmem:[%s4405_s3 + $0x124] ss:$16 sps:$4 sm:$0xff]  }
  0x18   :  { %156 = vmatprep.subr.bf16.mxu0 %v2898_v18  ;;  %v2973_v3 = vld [vmem:[%s4405_s3 + $0x188] ss:$16 sps:$4 sm:$0xff]   ;;  %v2981_v4 = vld [vmem:[%s4405_s3 + $0x16c] ss:$16 sps:$4 sm:$0xff]   ;;  %v2994_v13 = vld [vmem:[%s4405_s3 + $0x120] ss:$16 sps:$4 sm:$0xff]  }
  0x19   :  { %v2979_v5 = vld [vmem:[%s4405_s3 + $0x168] ss:$16 sps:$4 sm:$0xff]   ;;  %v2987_v7 = vld [vmem:[%s4405_s3 + $0x14c] ss:$16 sps:$4 sm:$0xff]   ;;  %v2995_v14 = vld [vmem:[%s4405_s3 + $0x104] ss:$16 sps:$4 sm:$0xff]  }
  0x1a   :  { %610 = vmatpush1.bf16.msra.mxu1 %v2940_v32  ;;  %v2985_v8 = vld [vmem:[%s4405_s3 + $0x148] ss:$16 sps:$4 sm:$0xff]   ;;  %v2993_v11 = vld [vmem:[%s4405_s3 + $0x12c] ss:$16 sps:$4 sm:$0xff]   ;;  %v3000_v17 = vld [vmem:[%s4405_s3 + $0x100] ss:$16 sps:$4 sm:$0xff]  }
  0x1b   :  { %157 = vmatpush1.bf16.msra.mxu0 %v2900_v21  ;;  %611 = vmatprep.subr.bf16.mxu1 %v2941_v33  ;;  %v2991_v12 = vld [vmem:[%s4405_s3 + $0x128] ss:$16 sps:$4 sm:$0xff]   ;;  %v2999_v15 = vld [vmem:[%s4405_s3 + $0x10c] ss:$16 sps:$4 sm:$0xff]  }
  0x1c   :  { %158 = vmatprep.subr.bf16.mxu0 %v2901_v22  ;;  %v2997_v16 = vld [vmem:[%s4405_s3 + $0x108] ss:$16 sps:$4 sm:$0xff]  }
  0x1d   :  { %v3003_v18 = vld [vmem:[%s4407_s5 + $0x18c] ss:$28 sps:$4 sm:$0xff]  }
  0x1e   :  { %612 = vmatpush1.bf16.msra.mxu1 %v2946_v36  ;;  %v3006_v19 = vld [vmem:[%s4407_s5 + $0x50c] ss:$28 sps:$4 sm:$0xff]  }
  0x1f   :  { %159 = vmatpush1.bf16.msra.mxu0 %v2903_v25  ;;  %613 = vmatprep.subr.bf16.mxu1 %v2947_v37 }
  0x20   :  { %642 = vmatprep.subr.bf16.mxu0 %v2909_v26 }
  0x22   :  { %177 = vmatmul.mubr.bf16.vlgmr.msra.gmra.mxu0 %v2904_v29  ;;  %614 = vmatpush1.bf16.msra.mxu1 %v2952_v40 }
  0x23   :  { %643 = vmatpush1.bf16.msra.mxu0 %v2907_v30  ;;  %615 = vmatprep.subr.bf16.mxu1 %v2953_v41 }
  0x24   :  { %644 = vmatprep.subr.bf16.mxu0 %v2915_v31 }
  0x26   :  { %616 = vmatpush2.bf16.msra.mxu1 %v2958_v44 }
  0x27   :  { %645 = vmatpush1.bf16.msra.mxu0 %v2913_v34  ;;  %617 = vmatprep.subr.bf16.mxu1 %v2959_v46 }
  0x28   :  { %646 = vmatprep.subr.bf16.mxu0 %v2921_v35 }
  0x2a   :  { %618 = vmatpush2.bf16.msra.mxu1 %v2964_v48 }
  0x2b   :  { %647 = vmatpush1.bf16.msra.mxu0 %v2919_v38  ;;  %619 = vmatprep.subr.bf16.mxu1 %v2965_v49 }
  0x2c   :  { %648 = vmatprep.subr.bf16.mxu0 %v2927_v39 }
  0x2e   :  { %620 = vmatpush2.bf16.msra.mxu1 %v2970_v52 }
  0x2f   :  { %649 = vmatpush1.bf16.msra.mxu0 %v2925_v42  ;;  %621 = vmatprep.subr.bf16.mxu1 %v2971_v53 }
  0x30   :  { %650 = vmatprep.subr.bf16.mxu0 %v2933_v43 }
  0x32   :  { %622 = vmatpush2.bf16.msra.mxu1 %v2976_v56 }
  0x33   :  { %651 = vmatpush1.bf16.msra.mxu0 %v2931_v45  ;;  %623 = vmatprep.subr.bf16.mxu1 %v2977_v57 }
  0x34   :  { %652 = vmatprep.subr.bf16.mxu0 %v2939_v47 }
  0x36   :  { %624 = vmatpush2.bf16.msra.mxu1 %v2982_v60 }
  0x37   :  { %653 = vmatpush1.bf16.msra.mxu0 %v2937_v50  ;;  %625 = vmatprep.subr.bf16.mxu1 %v2983_v6 }
  0x38   :  { %654 = vmatprep.subr.bf16.mxu0 %v2945_v51 }
  0x3a   :  { %626 = vmatpush2.bf16.msra.mxu1 %v2988_v9 }
  0x3b   :  { %655 = vmatpush1.bf16.msra.mxu0 %v2943_v54  ;;  %627 = vmatprep.subr.bf16.mxu1 %v2989_v10 }
  0x3c   :  { %656 = vmatprep.subr.bf16.mxu0 %v2951_v55 }
  0x3e   :  { %628 = vmatpush2.bf16.msra.mxu1 %v2994_v13 }
  0x3f   :  { %657 = vmatpush1.bf16.msra.mxu0 %v2949_v58  ;;  %629 = vmatprep.subr.bf16.mxu1 %v2995_v14 }
  0x40   :  { %658 = vmatprep.subr.bf16.mxu0 %v2957_v59 }
  0x42   :  { %630 = vmatpush2.bf16.msra.mxu1 %v3000_v17 }
  0x43   :  { %659 = vmatpush2.bf16.msra.mxu0 %v2955_v61  ;;  %2142 = vmatprep.subr.bf16.mxu1 %v3003_v18 }
  0x44   :  { %660 = vmatprep.subr.bf16.mxu0 %v2963_v62 }
  0x47   :  { %661 = vmatpush2.bf16.msra.mxu0 %v2961_v63 }
  0x48   :  { %662 = vmatprep.subr.bf16.mxu0 %v2969_v0 }
  0x4b   :  { %663 = vmatpush2.bf16.msra.mxu0 %v2967_v1 }
  0x4c   :  { %664 = vmatprep.subr.bf16.mxu0 %v2975_v2 }
  0x4f   :  { %665 = vmatpush2.bf16.msra.mxu0 %v2973_v3 }
  0x50   :  { %666 = vmatprep.subr.bf16.mxu0 %v2981_v4 }
  0x53   :  { %667 = vmatpush2.bf16.msra.mxu0 %v2979_v5 }
  0x54   :  { %668 = vmatprep.subr.bf16.mxu0 %v2987_v7 }
  0x57   :  { %669 = vmatpush2.bf16.msra.mxu0 %v2985_v8 }
  0x58   :  { %670 = vmatprep.subr.bf16.mxu0 %v2993_v11 }
  0x5b   :  { %671 = vmatpush2.bf16.msra.mxu0 %v2991_v12 }
  0x5c   :  { %672 = vmatprep.subr.bf16.mxu0 %v2999_v15 }
  0x5f   :  { %673 = vmatpush2.bf16.msra.mxu0 %v2997_v16 }
  0x60   :  { %2185 = vmatprep.subr.bf16.mxu0 %v3006_v19 }
  0x61   :  { %12 = vsyncpa [#allocation3], 0  ;;  %v48_v20 = vlaneseq  ;;  %v46_v24 = vld [vmem:[%s4404_s2] sm:$0x3]  ;;  %v3001_v40 = vld [vmem:[%s4407_s5 + $0x188] ss:$28 sps:$4 sm:$0xff]  }
  0x62   :  { %v3004_v41 = vld [vmem:[%s4407_s5 + $0x508] ss:$28 sps:$4 sm:$0xff]   ;;  %v3009_v43 = vld [vmem:[%s4407_s5 + $0x154] ss:$28 sps:$4 sm:$0xff]   ;;  %v3015_v47 = vld [vmem:[%s4407_s5 + $0x11c] ss:$28 sps:$4 sm:$0xff]  }
  0x63   :  { %v3664_v21 = vshrl.u32 %v48_v20, 7  ;;  %v3012_v44 = vld [vmem:[%s4407_s5 + $0x4d4] ss:$28 sps:$4 sm:$0xff]   ;;  %v3018_v48 = vld [vmem:[%s4407_s5 + $0x49c] ss:$28 sps:$4 sm:$0xff]   ;;  %vm2502_vm0 = vcmask 130048  }
  0x64   :  { %v3007_v45 = vld [vmem:[%s4407_s5 + $0x150] ss:$28 sps:$4 sm:$0xff]   ;;  %v3013_v49 = vld [vmem:[%s4407_s5 + $0x118] ss:$28 sps:$4 sm:$0xff]   ;;  %v3021_v51 = vld [vmem:[%s4407_s5 + $0xe4] ss:$28 sps:$4 sm:$0xff]  }
  0x65   :  { %v3667_v22 = vsub.s32 1, %v3664_v21  ;;  %v3670_v23 = vsub.s32 0, %v3664_v21  ;;  %v3010_v46 = vld [vmem:[%s4407_s5 + $0x4d0] ss:$28 sps:$4 sm:$0xff]   ;;  %v3016_v50 = vld [vmem:[%s4407_s5 + $0x498] ss:$28 sps:$4 sm:$0xff]  }
  0x66   :  { %v3024_v52 = vld [vmem:[%s4407_s5 + $0x464] ss:$28 sps:$4 sm:$0xff]   ;;  %v3027_v55 = vld [vmem:[%s4407_s5 + $0xac] ss:$28 sps:$4 sm:$0xff]   ;;  %v3033_v59 = vld [vmem:[%s4407_s5 + $0x74] ss:$28 sps:$4 sm:$0xff]  }
  0x67   :  { %v55_v26 = vrot.slane %v46_v24, %v3667_v22  ;;  %v51_v27 = vrot.slane %v46_v24, %v3670_v23  ;;  %v3019_v53 = vld [vmem:[%s4407_s5 + $0xe0] ss:$28 sps:$4 sm:$0xff]   ;;  %v3030_v56 = vld [vmem:[%s4407_s5 + $0x42c] ss:$28 sps:$4 sm:$0xff]   ;;  %v3036_v60 = vld [vmem:[%s4407_s5 + $0x3f4] ss:$28 sps:$4 sm:$0xff]  }
  0x68   :  { %v3022_v54 = vld [vmem:[%s4407_s5 + $0x460] ss:$28 sps:$4 sm:$0xff]   ;;  %v3025_v57 = vld [vmem:[%s4407_s5 + $0xa8] ss:$28 sps:$4 sm:$0xff]   ;;  %v3031_v61 = vld [vmem:[%s4407_s5 + $0x70] ss:$28 sps:$4 sm:$0xff]  }
  0x69   :  { %v3028_v58 = vld [vmem:[%s4407_s5 + $0x428] ss:$28 sps:$4 sm:$0xff]   ;;  %v3034_v62 = vld [vmem:[%s4407_s5 + $0x3f0] ss:$28 sps:$4 sm:$0xff]   ;;  %v3039_v63 = vld [vmem:[%s4407_s5 + $0x3c] ss:$28 sps:$4 sm:$0xff]  }
  0x6a   :  { %v3042_v0 = vld [vmem:[%s4407_s5 + $0x3bc] ss:$28 sps:$4 sm:$0xff]   ;;  %v3045_v3 = vld [vmem:[%s4407_s5 + $0x4] ss:$28 sps:$4 sm:$0xff]   ;;  %v3051_v7 = vld [vmem:[%s4407_s5 + $0x34c] ss:$28 sps:$4 sm:$0xff]  }
  0x6b   :  { %v3037_v1 = vld [vmem:[%s4407_s5 + $0x38] ss:$28 sps:$4 sm:$0xff]   ;;  %v3048_v4 = vld [vmem:[%s4407_s5 + $0x384] ss:$28 sps:$4 sm:$0xff]   ;;  %v3054_v8 = vld [vmem:[%s4407_s5 + $0x6cc] ss:$28 sps:$4 sm:$0xff]  }
  0x6c   :  { %v3040_v2 = vld [vmem:[%s4407_s5 + $0x3b8] ss:$28 sps:$4 sm:$0xff]   ;;  %v3043_v5 = vld [vmem:[%s4407_s5] ss:$28 sps:$4 sm:$0xff]   ;;  %v3049_v9 = vld [vmem:[%s4407_s5 + $0x348] ss:$28 sps:$4 sm:$0xff]  }
  0x6d   :  { %v3046_v6 = vld [vmem:[%s4407_s5 + $0x380] ss:$28 sps:$4 sm:$0xff]   ;;  %v3052_v10 = vld [vmem:[%s4407_s5 + $0x6c8] ss:$28 sps:$4 sm:$0xff]   ;;  %v3057_v11 = vld [vmem:[%s4407_s5 + $0x314] ss:$28 sps:$4 sm:$0xff]  }
  0x6e   :  { %v3060_v12 = vld [vmem:[%s4407_s5 + $0x694] ss:$28 sps:$4 sm:$0xff]   ;;  %v3063_v15 = vld [vmem:[%s4407_s5 + $0x2dc] ss:$28 sps:$4 sm:$0xff]   ;;  %v3069_v19 = vld [vmem:[%s4407_s5 + $0x2a4] ss:$28 sps:$4 sm:$0xff]  }
  0x6f   :  { %v3055_v13 = vld [vmem:[%s4407_s5 + $0x310] ss:$28 sps:$4 sm:$0xff]   ;;  %v3066_v16 = vld [vmem:[%s4407_s5 + $0x65c] ss:$28 sps:$4 sm:$0xff]   ;;  %v3072_v20 = vld [vmem:[%s4407_s5 + $0x624] ss:$28 sps:$4 sm:$0xff]  }
  0x70   :  { %v3058_v14 = vld [vmem:[%s4407_s5 + $0x690] ss:$28 sps:$4 sm:$0xff]   ;;  %v3061_v17 = vld [vmem:[%s4407_s5 + $0x2d8] ss:$28 sps:$4 sm:$0xff]   ;;  %v3067_v24 = vld [vmem:[%s4407_s5 + $0x2a0] ss:$28 sps:$4 sm:$0xff]  }
  0x71   :  { %v3064_v18 = vld [vmem:[%s4407_s5 + $0x658] ss:$28 sps:$4 sm:$0xff]  }
  0xe2   :  { %v178_v25 = vpop.f32.mrf.mxu0 }
  0xe3   :  { %v179_v32 = vadd.f32 %v178_v25, %v51_v27  ;;  %v3070_v25 = vld [vmem:[%s4407_s5 + $0x620] ss:$28 sps:$4 sm:$0xff]  }
  0xe4   :  { %v180_v28 = vpop.f32.mrf.mxu0 }
  0xe5   :  { %v181_v30 = vadd.f32 %v180_v28, %v55_v26  ;;  %v187_v38 = vmax.f32 %v179_v32, 0.0  ;;  %v3073_v28 = vld [vmem:[%s4407_s5 + $0x268] ss:$28 sps:$4 sm:$0xff]   ;;  %v3079_v32 = vld [vmem:[%s4407_s5 + $0x230] ss:$28 sps:$4 sm:$0xff]  }
  0xe6   :  { %v182_v29 = vpop.f32.mrf.mxu0 }
  0xe7   :  { %v183_v31 = vadd.f32 %v182_v29, %v51_v27  ;;  %v188_v36 = vmax.f32 %v181_v30, 0.0  ;;  %v3078_v27 = vld [vmem:[%s4407_s5 + $0x5ec] ss:$28 sps:$4 sm:$0xff]   ;;  %v3081_v30 = vld [vmem:[%s4407_s5 + $0x234] ss:$28 sps:$4 sm:$0xff]  }
  0xe8   :  { %v184_v33 = vpop.f32.mrf.mxu0  ;;  %v3076_v29 = vld [vmem:[%s4407_s5 + $0x5e8] ss:$28 sps:$4 sm:$0xff]  }
  0xe9   :  { %v185_v34 = vadd.f32 %v184_v33, %v55_v26  ;;  %v189_v35 = vmax.f32 %v183_v31, 0.0  ;;  %v3075_v26 = vld [vmem:[%s4407_s5 + $0x26c] ss:$28 sps:$4 sm:$0xff]   ;;  %v3084_v31 = vld [vmem:[%s4407_s5 + $0x5b4] ss:$28 sps:$4 sm:$0xff]  }
  0xea   :  { %v3082_v33 = vld [vmem:[%s4407_s5 + $0x5b0] ss:$28 sps:$4 sm:$0xff]  }
  0xeb   :  { %v190_v37 = vmax.f32 %v185_v34, 0.0  ;;  %v191_v42 = vpack.c.bf16 %v189_v35, %v187_v38  ;;  %v3087_v34 = vld [vmem:[%s4407_s5 + $0x1fc] ss:$28 sps:$4 sm:$0xff]   ;;  %v3093_v38 = vld [vmem:[%s4407_s5 + $0x1c4] ss:$28 sps:$4 sm:$0xff]  }
  0xec   :  { %v3090_v35 = vld [vmem:[%s4407_s5 + $0x57c] ss:$28 sps:$4 sm:$0xff]  }
  0xed   :  { %v192_v39 = vpack.c.bf16 %v190_v37, %v188_v36  ;;  %v3085_v36 = vld [vmem:[%s4407_s5 + $0x1f8] ss:$28 sps:$4 sm:$0xff]  }
  0xee   :  { %v3088_v37 = vld [vmem:[%s4407_s5 + $0x578] ss:$28 sps:$4 sm:$0xff]  }
  0xef   :  { %631 = vmatprep.mubr.bf16.mxu1 %v192_v39  ;;  %674 = vmatprep.mubr.bf16.mxu0 %v192_v39  ;;  %v3096_v39 = vld [vmem:[%s4407_s5 + $0x544] ss:$28 sps:$4 sm:$0xff]  }
  0xf0   :  { %632 = vmatmul.mubr.bf16.vlgmr.msra.gmra.mxu1 %v191_v42  ;;  %675 = vmatmul.mubr.bf16.vlgmr.msra.gmra.mxu0 %v191_v42  ;;  %v3099_v42 = vld [vmem:[%s4407_s5 + $0x194] ss:$28 sps:$4 sm:$0xff]  }
  0xf1   :  { %2143 = vmatpush1.bf16.msra.mxu1 %v3001_v40  ;;  %2186 = vmatpush1.bf16.msra.mxu0 %v3004_v41  ;;  %v3091_v40 = vld [vmem:[%s4407_s5 + $0x1c0] ss:$28 sps:$4 sm:$0xff]  }
  0xf2   :  { %2144 = vmatprep.subr.bf16.mxu1 %v3009_v43  ;;  %2187 = vmatprep.subr.bf16.mxu0 %v3012_v44  ;;  %v3094_v41 = vld [vmem:[%s4407_s5 + $0x540] ss:$28 sps:$4 sm:$0xff]   ;;  %v3102_v43 = vld [vmem:[%s4407_s5 + $0x514] ss:$28 sps:$4 sm:$0xff]   ;;  %v273_v44 = vsub.s32 3, %v3664_v21 }
  0xf5   :  { %2145 = vmatpush1.bf16.msra.mxu1 %v3007_v45  ;;  %2188 = vmatpush1.bf16.msra.mxu0 %v3010_v46  ;;  %v269_v45 = vsub.s32 2, %v3664_v21  ;;  %v257_v46 = vld [vmem:[%s4406_s4] sm:$0xf] }
  0xf6   :  { %2146 = vmatprep.subr.bf16.mxu1 %v3015_v47  ;;  %2189 = vmatprep.subr.bf16.mxu0 %v3018_v48 }
  0xf9   :  { %2147 = vmatpush1.bf16.msra.mxu1 %v3013_v49  ;;  %2190 = vmatpush1.bf16.msra.mxu0 %v3016_v50  ;;  %v266_v49 = vrot.slane %v257_v46, %v3667_v22  ;;  %v274_v50 = vrot.slane %v257_v46, %v273_v44 }
  0xfa   :  { %2148 = vmatprep.subr.bf16.mxu1 %v3021_v51  ;;  %2191 = vmatprep.subr.bf16.mxu0 %v3024_v52  ;;  %v262_v51 = vrot.slane %v257_v46, %v3670_v23  ;;  %v270_v52 = vrot.slane %v257_v46, %v269_v45  ;;  %v3141_v46 = vld [vmem:[%s4407_s5 + $0xc] ss:$28 sps:$4 sm:$0xff]  }
  0xfd   :  { %2149 = vmatpush1.bf16.msra.mxu1 %v3019_v53  ;;  %2192 = vmatpush1.bf16.msra.mxu0 %v3022_v54 }
  0xfe   :  { %2150 = vmatprep.subr.bf16.mxu1 %v3027_v55  ;;  %2193 = vmatprep.subr.bf16.mxu0 %v3030_v56 }
 0x101   :  { %2151 = vmatpush1.bf16.msra.mxu1 %v3025_v57  ;;  %2194 = vmatpush1.bf16.msra.mxu0 %v3028_v58 }
 0x102   :  { %2152 = vmatprep.subr.bf16.mxu1 %v3033_v59  ;;  %2195 = vmatprep.subr.bf16.mxu0 %v3036_v60 }
 0x105   :  { %2153 = vmatpush1.bf16.msra.mxu1 %v3031_v61  ;;  %2196 = vmatpush1.bf16.msra.mxu0 %v3034_v62 }
 0x106   :  { %2154 = vmatprep.subr.bf16.mxu1 %v3039_v63  ;;  %2197 = vmatprep.subr.bf16.mxu0 %v3042_v0 }
 0x109   :  { %2155 = vmatpush1.bf16.msra.mxu1 %v3037_v1  ;;  %2198 = vmatpush1.bf16.msra.mxu0 %v3040_v2 }
 0x10a   :  { %2156 = vmatprep.subr.bf16.mxu1 %v3045_v3  ;;  %2199 = vmatprep.subr.bf16.mxu0 %v3048_v4 }
 0x10d   :  { %2157 = vmatpush1.bf16.msra.mxu1 %v3043_v5  ;;  %2200 = vmatpush1.bf16.msra.mxu0 %v3046_v6 }
 0x10e   :  { %2158 = vmatprep.subr.bf16.mxu1 %v3051_v7  ;;  %2201 = vmatprep.subr.bf16.mxu0 %v3054_v8 }
 0x111   :  { %2159 = vmatpush2.bf16.msra.mxu1 %v3049_v9  ;;  %2202 = vmatpush2.bf16.msra.mxu0 %v3052_v10 }
 0x112   :  { %2160 = vmatprep.subr.bf16.mxu1 %v3057_v11  ;;  %2203 = vmatprep.subr.bf16.mxu0 %v3060_v12 }
 0x115   :  { %2161 = vmatpush2.bf16.msra.mxu1 %v3055_v13  ;;  %2204 = vmatpush2.bf16.msra.mxu0 %v3058_v14  ;;  %v3097_v13 = vld [vmem:[%s4407_s5 + $0x190] ss:$28 sps:$4 sm:$0xff]  }
 0x116   :  { %2162 = vmatprep.subr.bf16.mxu1 %v3063_v15  ;;  %2205 = vmatprep.subr.bf16.mxu0 %v3066_v16  ;;  %v3100_v14 = vld [vmem:[%s4407_s5 + $0x510] ss:$28 sps:$4 sm:$0xff]  }
 0x119   :  { %2163 = vmatpush2.bf16.msra.mxu1 %v3061_v17  ;;  %2206 = vmatpush2.bf16.msra.mxu0 %v3064_v18  ;;  %v3105_v17 = vld [vmem:[%s4407_s5 + $0x15c] ss:$28 sps:$4 sm:$0xff]  }
 0x11a   :  { %2164 = vmatprep.subr.bf16.mxu1 %v3069_v19  ;;  %2207 = vmatprep.subr.bf16.mxu0 %v3072_v20  ;;  %v3108_v18 = vld [vmem:[%s4407_s5 + $0x4dc] ss:$28 sps:$4 sm:$0xff]  }
 0x11b   :  { %v3103_v19 = vld [vmem:[%s4407_s5 + $0x158] ss:$28 sps:$4 sm:$0xff]  }
 0x11c   :  { %v3106_v20 = vld [vmem:[%s4407_s5 + $0x4d8] ss:$28 sps:$4 sm:$0xff]  }
 0x11d   :  { %2165 = vmatpush2.bf16.msra.mxu1 %v3067_v24  ;;  %2208 = vmatpush2.bf16.msra.mxu0 %v3070_v25  ;;  %v3111_v24 = vld [vmem:[%s4407_s5 + $0x124] ss:$28 sps:$4 sm:$0xff]  }
 0x11e   :  { %2166 = vmatprep.subr.bf16.mxu1 %v3075_v26  ;;  %2209 = vmatprep.subr.bf16.mxu0 %v3078_v27  ;;  %v3114_v25 = vld [vmem:[%s4407_s5 + $0x4a4] ss:$28 sps:$4 sm:$0xff]  }
 0x11f   :  { %v3109_v26 = vld [vmem:[%s4407_s5 + $0x120] ss:$28 sps:$4 sm:$0xff]  }
 0x120   :  { %v3112_v27 = vld [vmem:[%s4407_s5 + $0x4a0] ss:$28 sps:$4 sm:$0xff]  }
 0x121   :  { %2167 = vmatpush2.bf16.msra.mxu1 %v3073_v28  ;;  %2210 = vmatpush2.bf16.msra.mxu0 %v3076_v29  ;;  %v3117_v28 = vld [vmem:[%s4407_s5 + $0xec] ss:$28 sps:$4 sm:$0xff]  }
 0x122   :  { %2168 = vmatprep.subr.bf16.mxu1 %v3081_v30  ;;  %2211 = vmatprep.subr.bf16.mxu0 %v3084_v31  ;;  %v3120_v29 = vld [vmem:[%s4407_s5 + $0x46c] ss:$28 sps:$4 sm:$0xff]  }
 0x123   :  { %v3115_v30 = vld [vmem:[%s4407_s5 + $0xe8] ss:$28 sps:$4 sm:$0xff]  }
 0x124   :  { %v3118_v31 = vld [vmem:[%s4407_s5 + $0x468] ss:$28 sps:$4 sm:$0xff]  }
 0x125   :  { %2169 = vmatpush2.bf16.msra.mxu1 %v3079_v32  ;;  %2212 = vmatpush2.bf16.msra.mxu0 %v3082_v33  ;;  %v3123_v32 = vld [vmem:[%s4407_s5 + $0xb4] ss:$28 sps:$4 sm:$0xff]  }
 0x126   :  { %2170 = vmatprep.subr.bf16.mxu1 %v3087_v34  ;;  %2213 = vmatprep.subr.bf16.mxu0 %v3090_v35  ;;  %v3126_v33 = vld [vmem:[%s4407_s5 + $0x434] ss:$28 sps:$4 sm:$0xff]  }
 0x127   :  { %v3121_v34 = vld [vmem:[%s4407_s5 + $0xb0] ss:$28 sps:$4 sm:$0xff]  }
 0x128   :  { %v3124_v35 = vld [vmem:[%s4407_s5 + $0x430] ss:$28 sps:$4 sm:$0xff]  }
 0x129   :  { %2171 = vmatpush2.bf16.msra.mxu1 %v3085_v36  ;;  %2214 = vmatpush2.bf16.msra.mxu0 %v3088_v37  ;;  %v3129_v36 = vld [vmem:[%s4407_s5 + $0x7c] ss:$28 sps:$4 sm:$0xff]  }
 0x12a   :  { %2172 = vmatprep.subr.bf16.mxu1 %v3093_v38  ;;  %2215 = vmatprep.subr.bf16.mxu0 %v3096_v39  ;;  %v3132_v37 = vld [vmem:[%s4407_s5 + $0x3fc] ss:$28 sps:$4 sm:$0xff]  }
 0x12b   :  { %v3127_v38 = vld [vmem:[%s4407_s5 + $0x78] ss:$28 sps:$4 sm:$0xff]  }
 0x12c   :  { %v3130_v39 = vld [vmem:[%s4407_s5 + $0x3f8] ss:$28 sps:$4 sm:$0xff]  }
 0x12d   :  { %2173 = vmatpush2.bf16.msra.mxu1 %v3091_v40  ;;  %2216 = vmatpush2.bf16.msra.mxu0 %v3094_v41  ;;  %v3135_v40 = vld [vmem:[%s4407_s5 + $0x44] ss:$28 sps:$4 sm:$0xff]  }
 0x12e   :  { %2228 = vmatprep.subr.bf16.mxu1 %v3099_v42  ;;  %2271 = vmatprep.subr.bf16.mxu0 %v3102_v43  ;;  %v3138_v41 = vld [vmem:[%s4407_s5 + $0x3c4] ss:$28 sps:$4 sm:$0xff]  }
 0x12f   :  { %v3133_v42 = vld [vmem:[%s4407_s5 + $0x40] ss:$28 sps:$4 sm:$0xff]  }
 0x130   :  { %v3136_v43 = vld [vmem:[%s4407_s5 + $0x3c0] ss:$28 sps:$4 sm:$0xff]  }
 0x1b0   :  { %v633_v47 = vpop.f32.mrf.mxu1  ;;  %v676_v48 = vpop.f32.mrf.mxu0 }
 0x1b1   :  { %v634_v61 = vadd.f32 %v633_v47, %v262_v51  ;;  %v677_v62 = vadd.f32 %v676_v48, %v270_v52  ;;  %v3144_v47 = vld [vmem:[%s4407_s5 + $0x38c] ss:$28 sps:$4 sm:$0xff]  }
 0x1b2   :  { %v635_v53 = vpop.f32.mrf.mxu1  ;;  %v678_v54 = vpop.f32.mrf.mxu0  ;;  %v3139_v48 = vld [vmem:[%s4407_s5 + $0x8] ss:$28 sps:$4 sm:$0xff]  }
 0x1b3   :  { %v636_v57 = vadd.f32 %v635_v53, %v266_v49  ;;  %v679_v58 = vadd.f32 %v678_v54, %v274_v50  ;;  %v685_v9 = vmax.f32 %v634_v61, 0.0  ;;  %v687_v10 = vmax.f32 %v677_v62, 0.0  ;;  %v3148_v53 = vld [vmem:[%s4407_s5 + $0x6d0] ss:$28 sps:$4 sm:$0xff]   ;;  %v3153_v54 = vld [vmem:[%s4407_s5 + $0x31c] ss:$28 sps:$4 sm:$0xff]  }
 0x1b4   :  { %v637_v55 = vpop.f32.mrf.mxu1  ;;  %v680_v56 = vpop.f32.mrf.mxu0  ;;  %v3160_v61 = vld [vmem:[%s4407_s5 + $0x660] ss:$28 sps:$4 sm:$0xff]   ;;  %v3165_v62 = vld [vmem:[%s4407_s5 + $0x2ac] ss:$28 sps:$4 sm:$0xff]  }
 0x1b5   :  { %v638_v59 = vadd.f32 %v637_v55, %v262_v51  ;;  %v681_v60 = vadd.f32 %v680_v56, %v270_v52  ;;  %v686_v5 = vmax.f32 %v636_v57, 0.0  ;;  %v688_v6 = vmax.f32 %v679_v58, 0.0  ;;  %v3150_v51 = vld [vmem:[%s4407_s5 + $0x6d4] ss:$28 sps:$4 sm:$0xff]   ;;  %v3156_v55 = vld [vmem:[%s4407_s5 + $0x69c] ss:$28 sps:$4 sm:$0xff]  }
 0x1b6   :  { %v639_v63 = vpop.f32.mrf.mxu1  ;;  %v682_v0 = vpop.f32.mrf.mxu0  ;;  %v3145_v52 = vld [vmem:[%s4407_s5 + $0x350] ss:$28 sps:$4 sm:$0xff]   ;;  %v3151_v56 = vld [vmem:[%s4407_s5 + $0x318] ss:$28 sps:$4 sm:$0xff]   ;;  %v3159_v58 = vld [vmem:[%s4407_s5 + $0x2e4] ss:$28 sps:$4 sm:$0xff]  }
 0x1b7   :  { %v640_v1 = vadd.f32 %v639_v63, %v266_v49  ;;  %v683_v2 = vadd.f32 %v682_v0, %v274_v50  ;;  %v689_v3 = vmax.f32 %v638_v59, 0.0  ;;  %v691_v4 = vmax.f32 %v681_v60, 0.0  ;;  %v3142_v49 = vld [vmem:[%s4407_s5 + $0x388] ss:$28 sps:$4 sm:$0xff]   ;;  %v3147_v50 = vld [vmem:[%s4407_s5 + $0x354] ss:$28 sps:$4 sm:$0xff]  }
 0x1b8   :  { %v3154_v57 = vld [vmem:[%s4407_s5 + $0x698] ss:$28 sps:$4 sm:$0xff]   ;;  %v3162_v59 = vld [vmem:[%s4407_s5 + $0x664] ss:$28 sps:$4 sm:$0xff]   ;;  %v3168_v63 = vld [vmem:[%s4407_s5 + $0x62c] ss:$28 sps:$4 sm:$0xff]  }
 0x1b9   :  { %v690_v7 = vmax.f32 %v640_v1, 0.0  ;;  %v692_v8 = vmax.f32 %v683_v2, 0.0  ;;  %v3890_v15 = vpack.c.bf16 %v689_v3, %v685_v9  ;;  %v3892_v16 = vpack.c.bf16 %v691_v4, %v687_v10  ;;  %v3157_v60 = vld [vmem:[%s4407_s5 + $0x2e0] ss:$28 sps:$4 sm:$0xff]   ;;  %v3163_v0 = vld [vmem:[%s4407_s5 + $0x2a8] ss:$28 sps:$4 sm:$0xff]  }
 0x1ba   :  { %v3166_v1 = vld [vmem:[%s4407_s5 + $0x628] ss:$28 sps:$4 sm:$0xff]   ;;  %v3171_v2 = vld [vmem:[%s4407_s5 + $0x274] ss:$28 sps:$4 sm:$0xff]  }
 0x1bb   :  { %v3880_v11 = vpack.c.bf16 %v690_v7, %v686_v5  ;;  %v3882_v12 = vpack.c.bf16 %v692_v8, %v688_v6  ;;  %v3174_v3 = vld [vmem:[%s4407_s5 + $0x5f4] ss:$28 sps:$4 sm:$0xff]   ;;  %v3177_v6 = vld [vmem:[%s4407_s5 + $0x23c] ss:$28 sps:$4 sm:$0xff]   ;;  %v3183_v10 = vld [vmem:[%s4407_s5 + $0x204] ss:$28 sps:$4 sm:$0xff]  }
 0x1bc   :  { %v3169_v4 = vld [vmem:[%s4407_s5 + $0x270] ss:$28 sps:$4 sm:$0xff]   ;;  %v3180_v7 = vld [vmem:[%s4407_s5 + $0x5bc] ss:$28 sps:$4 sm:$0xff]  }
 0x1bd   :  { %2174 = vmatprep.mubr.bf16.mxu1 %v3880_v11  ;;  %2217 = vmatprep.mubr.bf16.mxu0 %v3882_v12  ;;  %v3172_v5 = vld [vmem:[%s4407_s5 + $0x5f0] ss:$28 sps:$4 sm:$0xff]   ;;  %v3175_v8 = vld [vmem:[%s4407_s5 + $0x238] ss:$28 sps:$4 sm:$0xff]  }
 0x1be   :  { %2175 = vmatmul.mubr.bf16.vlgmr.msra.gmra.mxu1 %v3890_v15  ;;  %2218 = vmatmul.mubr.bf16.vlgmr.msra.gmra.mxu0 %v3892_v16  ;;  %v3178_v9 = vld [vmem:[%s4407_s5 + $0x5b8] ss:$28 sps:$4 sm:$0xff]  }
 0x1bf   :  { %2229 = vmatpush1.bf16.msra.mxu1 %v3097_v13  ;;  %2272 = vmatpush1.bf16.msra.mxu0 %v3100_v14  ;;  %v3186_v13 = vld [vmem:[%s4407_s5 + $0x584] ss:$28 sps:$4 sm:$0xff]  }
 0x1c0   :  { %2260 = vmatprep.mubr.bf16.mxu1 %v3880_v11  ;;  %2303 = vmatprep.mubr.bf16.mxu0 %v3882_v12  ;;  %v3181_v14 = vld [vmem:[%s4407_s5 + $0x200] ss:$28 sps:$4 sm:$0xff]  }
 0x1c1   :  { %2230 = vmatprep.subr.bf16.mxu1 %v3105_v17  ;;  %2273 = vmatprep.subr.bf16.mxu0 %v3108_v18  ;;  %v3184_v17 = vld [vmem:[%s4407_s5 + $0x580] ss:$28 sps:$4 sm:$0xff]   ;;  %v3189_v18 = vld [vmem:[%s4407_s5 + $0x1cc] ss:$28 sps:$4 sm:$0xff]  }
 0x1c3   :  { %2231 = vmatpush1.bf16.msra.mxu1 %v3103_v19  ;;  %2274 = vmatpush1.bf16.msra.mxu0 %v3106_v20  ;;  %v3192_v19 = vld [vmem:[%s4407_s5 + $0x54c] ss:$28 sps:$4 sm:$0xff]  }
 0x1c4   :  { %2232 = vmatprep.subr.bf16.mxu1 %v3111_v24  ;;  %2275 = vmatprep.subr.bf16.mxu0 %v3114_v25  ;;  %v3187_v20 = vld [vmem:[%s4407_s5 + $0x1c8] ss:$28 sps:$4 sm:$0xff]   ;;  %v3195_v25 = vld [vmem:[%s4407_s5 + $0x19c] ss:$28 sps:$4 sm:$0xff]  }
 0x1c5   :  { %v3190_v24 = vld [vmem:[%s4407_s5 + $0x548] ss:$28 sps:$4 sm:$0xff]  }
 0x1c7   :  { %2233 = vmatpush1.bf16.msra.mxu1 %v3109_v26  ;;  %2276 = vmatpush1.bf16.msra.mxu0 %v3112_v27  ;;  %v3198_v26 = vld [vmem:[%s4407_s5 + $0x51c] ss:$28 sps:$4 sm:$0xff]  }
 0x1c8   :  { %2234 = vmatprep.subr.bf16.mxu1 %v3117_v28  ;;  %2277 = vmatprep.subr.bf16.mxu0 %v3120_v29  ;;  %v3193_v27 = vld [vmem:[%s4407_s5 + $0x198] ss:$28 sps:$4 sm:$0xff]   ;;  %v3201_v29 = vld [vmem:[%s4407_s5 + $0x164] ss:$28 sps:$4 sm:$0xff]  }
 0x1c9   :  { %v3196_v28 = vld [vmem:[%s4407_s5 + $0x518] ss:$28 sps:$4 sm:$0xff]  }
 0x1cb   :  { %2235 = vmatpush1.bf16.msra.mxu1 %v3115_v30  ;;  %2278 = vmatpush1.bf16.msra.mxu0 %v3118_v31  ;;  %v3204_v30 = vld [vmem:[%s4407_s5 + $0x4e4] ss:$28 sps:$4 sm:$0xff]  }
 0x1cc   :  { %2236 = vmatprep.subr.bf16.mxu1 %v3123_v32  ;;  %2279 = vmatprep.subr.bf16.mxu0 %v3126_v33  ;;  %v3199_v31 = vld [vmem:[%s4407_s5 + $0x160] ss:$28 sps:$4 sm:$0xff]   ;;  %v3207_v33 = vld [vmem:[%s4407_s5 + $0x12c] ss:$28 sps:$4 sm:$0xff]  }
 0x1cd   :  { %v3202_v32 = vld [vmem:[%s4407_s5 + $0x4e0] ss:$28 sps:$4 sm:$0xff]  }
 0x1cf   :  { %2237 = vmatpush1.bf16.msra.mxu1 %v3121_v34  ;;  %2280 = vmatpush1.bf16.msra.mxu0 %v3124_v35  ;;  %v3210_v34 = vld [vmem:[%s4407_s5 + $0x4ac] ss:$28 sps:$4 sm:$0xff]  }
 0x1d0   :  { %2238 = vmatprep.subr.bf16.mxu1 %v3129_v36  ;;  %2281 = vmatprep.subr.bf16.mxu0 %v3132_v37  ;;  %v3205_v35 = vld [vmem:[%s4407_s5 + $0x128] ss:$28 sps:$4 sm:$0xff]   ;;  %v3213_v37 = vld [vmem:[%s4407_s5 + $0xf4] ss:$28 sps:$4 sm:$0xff]  }
 0x1d1   :  { %v3208_v36 = vld [vmem:[%s4407_s5 + $0x4a8] ss:$28 sps:$4 sm:$0xff]  }
 0x1d3   :  { %2239 = vmatpush1.bf16.msra.mxu1 %v3127_v38  ;;  %2282 = vmatpush1.bf16.msra.mxu0 %v3130_v39  ;;  %v3216_v38 = vld [vmem:[%s4407_s5 + $0x474] ss:$28 sps:$4 sm:$0xff]  }
 0x1d4   :  { %2240 = vmatprep.subr.bf16.mxu1 %v3135_v40  ;;  %2283 = vmatprep.subr.bf16.mxu0 %v3138_v41  ;;  %v3211_v39 = vld [vmem:[%s4407_s5 + $0xf0] ss:$28 sps:$4 sm:$0xff]   ;;  %v3219_v41 = vld [vmem:[%s4407_s5 + $0xbc] ss:$28 sps:$4 sm:$0xff]  }
 0x1d5   :  { %v3214_v40 = vld [vmem:[%s4407_s5 + $0x470] ss:$28 sps:$4 sm:$0xff]  }
 0x1d7   :  { %2241 = vmatpush1.bf16.msra.mxu1 %v3133_v42  ;;  %2284 = vmatpush1.bf16.msra.mxu0 %v3136_v43  ;;  %v3222_v42 = vld [vmem:[%s4407_s5 + $0x43c] ss:$28 sps:$4 sm:$0xff]  }
 0x1d8   :  { %2242 = vmatprep.subr.bf16.mxu1 %v3141_v46  ;;  %2285 = vmatprep.subr.bf16.mxu0 %v3144_v47  ;;  %v3217_v43 = vld [vmem:[%s4407_s5 + $0xb8] ss:$28 sps:$4 sm:$0xff]   ;;  %v3225_v47 = vld [vmem:[%s4407_s5 + $0x84] ss:$28 sps:$4 sm:$0xff]  }
 0x1d9   :  { %v3220_v46 = vld [vmem:[%s4407_s5 + $0x438] ss:$28 sps:$4 sm:$0xff]  }
 0x1db   :  { %2243 = vmatpush1.bf16.msra.mxu1 %v3139_v48  ;;  %2286 = vmatpush1.bf16.msra.mxu0 %v3142_v49  ;;  %v3228_v48 = vld [vmem:[%s4407_s5 + $0x404] ss:$28 sps:$4 sm:$0xff]  }
 0x1dc   :  { %2244 = vmatprep.subr.bf16.mxu1 %v3147_v50  ;;  %2287 = vmatprep.subr.bf16.mxu0 %v3150_v51  ;;  %v3223_v49 = vld [vmem:[%s4407_s5 + $0x80] ss:$28 sps:$4 sm:$0xff]   ;;  %v3231_v51 = vld [vmem:[%s4407_s5 + $0x4c] ss:$28 sps:$4 sm:$0xff]  }
 0x1dd   :  { %v3226_v50 = vld [vmem:[%s4407_s5 + $0x400] ss:$28 sps:$4 sm:$0xff]  }
 0x1df   :  { %2245 = vmatpush2.bf16.msra.mxu1 %v3145_v52  ;;  %2288 = vmatpush2.bf16.msra.mxu0 %v3148_v53  ;;  %v3234_v52 = vld [vmem:[%s4407_s5 + $0x3cc] ss:$28 sps:$4 sm:$0xff]  }
 0x1e0   :  { %2246 = vmatprep.subr.bf16.mxu1 %v3153_v54  ;;  %2289 = vmatprep.subr.bf16.mxu0 %v3156_v55  ;;  %v3229_v53 = vld [vmem:[%s4407_s5 + $0x48] ss:$28 sps:$4 sm:$0xff]   ;;  %v3237_v55 = vld [vmem:[%s4407_s5 + $0x14] ss:$28 sps:$4 sm:$0xff]  }
 0x1e1   :  { %v3232_v54 = vld [vmem:[%s4407_s5 + $0x3c8] ss:$28 sps:$4 sm:$0xff]  }
 0x1e3   :  { %2247 = vmatpush2.bf16.msra.mxu1 %v3151_v56  ;;  %2290 = vmatpush2.bf16.msra.mxu0 %v3154_v57  ;;  %v3240_v56 = vld [vmem:[%s4407_s5 + $0x394] ss:$28 sps:$4 sm:$0xff]  }
 0x1e4   :  { %2248 = vmatprep.subr.bf16.mxu1 %v3159_v58  ;;  %2291 = vmatprep.subr.bf16.mxu0 %v3162_v59  ;;  %v3235_v57 = vld [vmem:[%s4407_s5 + $0x10] ss:$28 sps:$4 sm:$0xff]   ;;  %v3243_v59 = vld [vmem:[%s4407_s5 + $0x35c] ss:$28 sps:$4 sm:$0xff]  }
 0x1e5   :  { %v3238_v58 = vld [vmem:[%s4407_s5 + $0x390] ss:$28 sps:$4 sm:$0xff]  }
 0x1e7   :  { %2249 = vmatpush2.bf16.msra.mxu1 %v3157_v60  ;;  %2292 = vmatpush2.bf16.msra.mxu0 %v3160_v61  ;;  %v3246_v60 = vld [vmem:[%s4407_s5 + $0x6dc] ss:$28 sps:$4 sm:$0xff]  }
 0x1e8   :  { %2250 = vmatprep.subr.bf16.mxu1 %v3165_v62  ;;  %2293 = vmatprep.subr.bf16.mxu0 %v3168_v63  ;;  %v3241_v61 = vld [vmem:[%s4407_s5 + $0x358] ss:$28 sps:$4 sm:$0xff]   ;;  %v3249_v63 = vld [vmem:[%s4407_s5 + $0x324] ss:$28 sps:$4 sm:$0xff]  }
 0x1e9   :  { %v3244_v62 = vld [vmem:[%s4407_s5 + $0x6d8] ss:$28 sps:$4 sm:$0xff]  }
 0x1eb   :  { %2251 = vmatpush2.bf16.msra.mxu1 %v3163_v0  ;;  %2294 = vmatpush2.bf16.msra.mxu0 %v3166_v1  ;;  %v3252_v0 = vld [vmem:[%s4407_s5 + $0x6a4] ss:$28 sps:$4 sm:$0xff]  }
 0x1ec   :  { %2252 = vmatprep.subr.bf16.mxu1 %v3171_v2  ;;  %2295 = vmatprep.subr.bf16.mxu0 %v3174_v3  ;;  %v3247_v1 = vld [vmem:[%s4407_s5 + $0x320] ss:$28 sps:$4 sm:$0xff]   ;;  %v3255_v3 = vld [vmem:[%s4407_s5 + $0x2ec] ss:$28 sps:$4 sm:$0xff]  }
 0x1ed   :  { %v3250_v2 = vld [vmem:[%s4407_s5 + $0x6a0] ss:$28 sps:$4 sm:$0xff]  }
 0x1ef   :  { %2253 = vmatpush2.bf16.msra.mxu1 %v3169_v4  ;;  %2296 = vmatpush2.bf16.msra.mxu0 %v3172_v5  ;;  %v3258_v4 = vld [vmem:[%s4407_s5 + $0x66c] ss:$28 sps:$4 sm:$0xff]  }
 0x1f0   :  { %2254 = vmatprep.subr.bf16.mxu1 %v3177_v6  ;;  %2297 = vmatprep.subr.bf16.mxu0 %v3180_v7  ;;  %v3253_v5 = vld [vmem:[%s4407_s5 + $0x2e8] ss:$28 sps:$4 sm:$0xff]   ;;  %v3261_v7 = vld [vmem:[%s4407_s5 + $0x2b4] ss:$28 sps:$4 sm:$0xff]  }
 0x1f1   :  { %v3256_v6 = vld [vmem:[%s4407_s5 + $0x668] ss:$28 sps:$4 sm:$0xff]  }
 0x1f3   :  { %2255 = vmatpush2.bf16.msra.mxu1 %v3175_v8  ;;  %2298 = vmatpush2.bf16.msra.mxu0 %v3178_v9  ;;  %v3264_v8 = vld [vmem:[%s4407_s5 + $0x634] ss:$28 sps:$4 sm:$0xff]  }
 0x1f4   :  { %2256 = vmatprep.subr.bf16.mxu1 %v3183_v10  ;;  %2299 = vmatprep.subr.bf16.mxu0 %v3186_v13  ;;  %v3259_v9 = vld [vmem:[%s4407_s5 + $0x2b0] ss:$28 sps:$4 sm:$0xff]   ;;  %v3267_v13 = vld [vmem:[%s4407_s5 + $0x27c] ss:$28 sps:$4 sm:$0xff]  }
 0x1f5   :  { %v3262_v10 = vld [vmem:[%s4407_s5 + $0x630] ss:$28 sps:$4 sm:$0xff]  }
 0x1f7   :  { %2257 = vmatpush2.bf16.msra.mxu1 %v3181_v14  ;;  %2300 = vmatpush2.bf16.msra.mxu0 %v3184_v17  ;;  %v3270_v14 = vld [vmem:[%s4407_s5 + $0x5fc] ss:$28 sps:$4 sm:$0xff]  }
 0x1f8   :  { %2258 = vmatprep.subr.bf16.mxu1 %v3189_v18  ;;  %2301 = vmatprep.subr.bf16.mxu0 %v3192_v19  ;;  %v3265_v17 = vld [vmem:[%s4407_s5 + $0x278] ss:$28 sps:$4 sm:$0xff]   ;;  %v3273_v19 = vld [vmem:[%s4407_s5 + $0x244] ss:$28 sps:$4 sm:$0xff]  }
 0x1f9   :  { %v3268_v18 = vld [vmem:[%s4407_s5 + $0x5f8] ss:$28 sps:$4 sm:$0xff]  }
 0x1fb   :  { %2259 = vmatpush2.bf16.msra.mxu1 %v3187_v20  ;;  %2302 = vmatpush2.bf16.msra.mxu0 %v3190_v24  ;;  %v3276_v20 = vld [vmem:[%s4407_s5 + $0x5c4] ss:$28 sps:$4 sm:$0xff]  }
 0x1fc   :  { %2314 = vmatprep.subr.bf16.mxu1 %v3195_v25  ;;  %2357 = vmatprep.subr.bf16.mxu0 %v3198_v26  ;;  %v3271_v24 = vld [vmem:[%s4407_s5 + $0x240] ss:$28 sps:$4 sm:$0xff]   ;;  %v3279_v26 = vld [vmem:[%s4407_s5 + $0x20c] ss:$28 sps:$4 sm:$0xff]  }
 0x1fd   :  { %v3274_v25 = vld [vmem:[%s4407_s5 + $0x5c0] ss:$28 sps:$4 sm:$0xff]  }
 0x1fe   :  { %2261 = vmatmul.mubr.bf16.vlgmr.msra.gmra.mxu1 %v3890_v15  ;;  %2304 = vmatmul.mubr.bf16.vlgmr.msra.gmra.mxu0 %v3892_v16 }
 0x1ff   :  { %2315 = vmatpush1.bf16.msra.mxu1 %v3193_v27  ;;  %2346 = vmatprep.mubr.bf16.mxu1 %v3880_v11  ;;  %v3282_v27 = vld [vmem:[%s4407_s5 + $0x58c] ss:$28 sps:$4 sm:$0xff]  }
 0x200   :  { %2358 = vmatpush1.bf16.msra.mxu0 %v3196_v28  ;;  %2389 = vmatprep.mubr.bf16.mxu0 %v3882_v12  ;;  %v3277_v28 = vld [vmem:[%s4407_s5 + $0x208] ss:$28 sps:$4 sm:$0xff]  }
 0x201   :  { %2316 = vmatprep.subr.bf16.mxu1 %v3201_v29  ;;  %2359 = vmatprep.subr.bf16.mxu0 %v3204_v30  ;;  %v3280_v29 = vld [vmem:[%s4407_s5 + $0x588] ss:$28 sps:$4 sm:$0xff]   ;;  %v3285_v30 = vld [vmem:[%s4407_s5 + $0x1d4] ss:$28 sps:$4 sm:$0xff]  }
 0x203   :  { %2317 = vmatpush1.bf16.msra.mxu1 %v3199_v31  ;;  %v3288_v31 = vld [vmem:[%s4407_s5 + $0x554] ss:$28 sps:$4 sm:$0xff]  }
 0x204   :  { %2360 = vmatpush1.bf16.msra.mxu0 %v3202_v32  ;;  %2318 = vmatprep.subr.bf16.mxu1 %v3207_v33  ;;  %v3283_v32 = vld [vmem:[%s4407_s5 + $0x1d0] ss:$28 sps:$4 sm:$0xff]  }
 0x205   :  { %2361 = vmatprep.subr.bf16.mxu0 %v3210_v34  ;;  %v3286_v33 = vld [vmem:[%s4407_s5 + $0x550] ss:$28 sps:$4 sm:$0xff]   ;;  %v3289_v34 = vld [vmem:[%s4407_s5 + $0x360] ss:$28 sps:$4 sm:$0xff]  }
 0x207   :  { %2319 = vmatpush1.bf16.msra.mxu1 %v3205_v35  ;;  %v3290_v35 = vld [vmem:[%s4407_s5 + $0x6e0] ss:$28 sps:$4 sm:$0xff]  }
 0x208   :  { %2362 = vmatpush1.bf16.msra.mxu0 %v3208_v36  ;;  %2320 = vmatprep.subr.bf16.mxu1 %v3213_v37  ;;  %v3291_v36 = vld [vmem:[%s4407_s5 + $0x1a0] ss:$28 sps:$4 sm:$0xff]  }
 0x209   :  { %2363 = vmatprep.subr.bf16.mxu0 %v3216_v38  ;;  %v3292_v37 = vld [vmem:[%s4407_s5 + $0x520] ss:$28 sps:$4 sm:$0xff]   ;;  %v3293_v38 = vld [vmem:[%s4407_s5 + $0x328] ss:$28 sps:$4 sm:$0xff]  }
 0x20b   :  { %2321 = vmatpush1.bf16.msra.mxu1 %v3211_v39  ;;  %v3294_v39 = vld [vmem:[%s4407_s5 + $0x6a8] ss:$28 sps:$4 sm:$0xff]  }
 0x20c   :  { %2364 = vmatpush1.bf16.msra.mxu0 %v3214_v40  ;;  %2322 = vmatprep.subr.bf16.mxu1 %v3219_v41  ;;  %v3295_v40 = vld [vmem:[%s4407_s5 + $0x168] ss:$28 sps:$4 sm:$0xff]  }
 0x20d   :  { %2365 = vmatprep.subr.bf16.mxu0 %v3222_v42  ;;  %v3296_v41 = vld [vmem:[%s4407_s5 + $0x4e8] ss:$28 sps:$4 sm:$0xff]   ;;  %v3297_v42 = vld [vmem:[%s4407_s5 + $0x2f0] ss:$28 sps:$4 sm:$0xff]  }
 0x20f   :  { %2323 = vmatpush1.bf16.msra.mxu1 %v3217_v43  ;;  %v3298_v43 = vld [vmem:[%s4407_s5 + $0x670] ss:$28 sps:$4 sm:$0xff]  }
 0x210   :  { %2366 = vmatpush1.bf16.msra.mxu0 %v3220_v46  ;;  %2324 = vmatprep.subr.bf16.mxu1 %v3225_v47  ;;  %v3300_v46 = vld [vmem:[%s4407_s5 + $0x4b0] ss:$28 sps:$4 sm:$0xff]   ;;  %v3302_v47 = vld [vmem:[%s4407_s5 + $0x638] ss:$28 sps:$4 sm:$0xff]  }
 0x211   :  { %2367 = vmatprep.subr.bf16.mxu0 %v3228_v48  ;;  %v3303_v48 = vld [vmem:[%s4407_s5 + $0xf8] ss:$28 sps:$4 sm:$0xff]  }
 0x213   :  { %2325 = vmatpush1.bf16.msra.mxu1 %v3223_v49  ;;  %v3304_v49 = vld [vmem:[%s4407_s5 + $0x478] ss:$28 sps:$4 sm:$0xff]  }
 0x214   :  { %2368 = vmatpush1.bf16.msra.mxu0 %v3226_v50  ;;  %2326 = vmatprep.subr.bf16.mxu1 %v3231_v51  ;;  %v3305_v50 = vld [vmem:[%s4407_s5 + $0x280] ss:$28 sps:$4 sm:$0xff]  }
 0x215   :  { %2369 = vmatprep.subr.bf16.mxu0 %v3234_v52  ;;  %v3306_v51 = vld [vmem:[%s4407_s5 + $0x600] ss:$28 sps:$4 sm:$0xff]  }
 0x216   :  { %v3307_v52 = vld [vmem:[%s4407_s5 + $0xc0] ss:$28 sps:$4 sm:$0xff]  }
 0x217   :  { %2327 = vmatpush1.bf16.msra.mxu1 %v3229_v53  ;;  %v3308_v53 = vld [vmem:[%s4407_s5 + $0x440] ss:$28 sps:$4 sm:$0xff]  }
 0x218   :  { %2370 = vmatpush1.bf16.msra.mxu0 %v3232_v54  ;;  %2328 = vmatprep.subr.bf16.mxu1 %v3237_v55  ;;  %v3309_v54 = vld [vmem:[%s4407_s5 + $0x248] ss:$28 sps:$4 sm:$0xff]  }
 0x219   :  { %2371 = vmatprep.subr.bf16.mxu0 %v3240_v56  ;;  %v3310_v55 = vld [vmem:[%s4407_s5 + $0x5c8] ss:$28 sps:$4 sm:$0xff]  }
 0x21a   :  { %v3311_v56 = vld [vmem:[%s4407_s5 + $0x88] ss:$28 sps:$4 sm:$0xff]  }
 0x21b   :  { %2329 = vmatpush1.bf16.msra.mxu1 %v3235_v57  ;;  %v3312_v57 = vld [vmem:[%s4407_s5 + $0x408] ss:$28 sps:$4 sm:$0xff]  }
 0x21c   :  { %2372 = vmatpush1.bf16.msra.mxu0 %v3238_v58  ;;  %2330 = vmatprep.subr.bf16.mxu1 %v3243_v59  ;;  %v3313_v58 = vld [vmem:[%s4407_s5 + $0x210] ss:$28 sps:$4 sm:$0xff]  }
 0x21d   :  { %2373 = vmatprep.subr.bf16.mxu0 %v3246_v60  ;;  %v3314_v59 = vld [vmem:[%s4407_s5 + $0x590] ss:$28 sps:$4 sm:$0xff]  }
 0x21e   :  { %v3315_v60 = vld [vmem:[%s4407_s5 + $0x50] ss:$28 sps:$4 sm:$0xff]  }
 0x21f   :  { %2331 = vmatpush2.bf16.msra.mxu1 %v3241_v61  ;;  %v3316_v61 = vld [vmem:[%s4407_s5 + $0x3d0] ss:$28 sps:$4 sm:$0xff]  }
 0x220   :  { %2374 = vmatpush2.bf16.msra.mxu0 %v3244_v62  ;;  %2332 = vmatprep.subr.bf16.mxu1 %v3249_v63  ;;  %v3317_v62 = vld [vmem:[%s4407_s5 + $0x1d8] ss:$28 sps:$4 sm:$0xff]  }
 0x221   :  { %2375 = vmatprep.subr.bf16.mxu0 %v3252_v0  ;;  %v3318_v63 = vld [vmem:[%s4407_s5 + $0x558] ss:$28 sps:$4 sm:$0xff]  }
 0x222   :  { %v3319_v0 = vld [vmem:[%s4407_s5 + $0x18] ss:$28 sps:$4 sm:$0xff]  }
 0x223   :  { %2333 = vmatpush2.bf16.msra.mxu1 %v3247_v1  ;;  %v3320_v1 = vld [vmem:[%s4407_s5 + $0x398] ss:$28 sps:$4 sm:$0xff]  }
 0x224   :  { %2376 = vmatpush2.bf16.msra.mxu0 %v3250_v2  ;;  %2334 = vmatprep.subr.bf16.mxu1 %v3255_v3  ;;  %v4381_v2 = vld [vmem:[%s4408_s6] sm:$0x7f] }
 0x225   :  { %2377 = vmatprep.subr.bf16.mxu0 %v3258_v4  ;;  %v958_v3 = vrot.slane %v4381_v2, %v3670_v23  ;;  %v962_v4 = vrot.slane %v4381_v2, %v3667_v22 }
 0x227   :  { %2335 = vmatpush2.bf16.msra.mxu1 %v3253_v5 }
 0x228   :  { %2378 = vmatpush2.bf16.msra.mxu0 %v3256_v6  ;;  %2336 = vmatprep.subr.bf16.mxu1 %v3261_v7 }
 0x229   :  { %2379 = vmatprep.subr.bf16.mxu0 %v3264_v8 }
 0x22b   :  { %2337 = vmatpush2.bf16.msra.mxu1 %v3259_v9 }
 0x22c   :  { %2380 = vmatpush2.bf16.msra.mxu0 %v3262_v10  ;;  %2338 = vmatprep.subr.bf16.mxu1 %v3267_v13 }
 0x22d   :  { %2381 = vmatprep.subr.bf16.mxu0 %v3270_v14 }
 0x22f   :  { %2339 = vmatpush2.bf16.msra.mxu1 %v3265_v17 }
 0x230   :  { %2382 = vmatpush2.bf16.msra.mxu0 %v3268_v18  ;;  %2340 = vmatprep.subr.bf16.mxu1 %v3273_v19 }
 0x231   :  { %2383 = vmatprep.subr.bf16.mxu0 %v3276_v20 }
 0x233   :  { %2341 = vmatpush2.bf16.msra.mxu1 %v3271_v24 }
 0x234   :  { %2384 = vmatpush2.bf16.msra.mxu0 %v3274_v25  ;;  %2342 = vmatprep.subr.bf16.mxu1 %v3279_v26 }
 0x235   :  { %2385 = vmatprep.subr.bf16.mxu0 %v3282_v27 }
 0x237   :  { %2343 = vmatpush2.bf16.msra.mxu1 %v3277_v28  ;;  %v966_v28 = vrot.slane %v4381_v2, %v269_v45 }
 0x238   :  { %2386 = vmatpush2.bf16.msra.mxu0 %v3280_v29  ;;  %2344 = vmatprep.subr.bf16.mxu1 %v3285_v30  ;;  %v970_v29 = vrot.slane %v4381_v2, %v273_v44 }
 0x239   :  { %2387 = vmatprep.subr.bf16.mxu0 %v3288_v31 }
 0x23b   :  { %2345 = vmatpush2.bf16.msra.mxu1 %v3283_v32 }
 0x23c   :  { %2388 = vmatpush2.bf16.msra.mxu0 %v3286_v33  ;;  %2832 = vmatprep.subr.bf16.mxu1 %v3289_v34 }
 0x23d   :  { %2854 = vmatprep.subr.bf16.mxu0 %v3290_v35 }
 0x23e   :  { %2347 = vmatmul.mubr.bf16.vlgmr.msra.gmra.mxu1 %v3890_v15 }
 0x23f   :  { %2390 = vmatmul.mubr.bf16.vlgmr.msra.gmra.mxu0 %v3892_v16  ;;  %2833 = vmatpush3.bf16.msra.mxu1 %v3291_v36 }
 0x240   :  { %2432 = vmatprep.mubr.bf16.mxu1 %v3880_v11  ;;  %2855 = vmatpush3.bf16.msra.mxu0 %v3292_v37  ;;  %v3299_v11 = vld [vmem:[%s4407_s5 + $0x130] ss:$28 sps:$4 sm:$0xff]  }
 0x241   :  { %2473 = vmatprep.mubr.bf16.mxu0 %v3882_v12  ;;  %2834 = vmatprep.subr.bf16.mxu1 %v3293_v38  ;;  %v3301_v12 = vld [vmem:[%s4407_s5 + $0x2b8] ss:$28 sps:$4 sm:$0xff]   ;;  %s3372_s5 = smov [#allocation2]  }
 0x242   :  { %2856 = vmatprep.subr.bf16.mxu0 %v3294_v39  ;;  %s2516_s6 = sshll.u32 %s3372_s5, 4  ;;  %s2517_s6 = int_to_ptr.vmem [resolvable:$true] %s2516_s6 }
 0x243   :  { %2835 = vmatpush3.bf16.msra.mxu1 %v3295_v40  ;;  %s3349_s23 = scalar_lea.vmem %s2517_s6, 1792  ;;  %p3354_p1 = scmp.lt.s32.totalorder %s2517_s6, %s2517_s6 }
 0x244   :  { %2857 = vmatpush3.bf16.msra.mxu0 %v3296_v41  ;;  %2836 = vmatprep.subr.bf16.mxu1 %v3297_v42  ;;  %p3350_p0 = scmp.ne.s32.totalorder %s2517_s6, %s3349_s23  ;;  %p3355_p2 = scmp.lt.s32.totalorder %s3349_s23, %s3349_s23 }
 0x245   :  { %2858 = vmatprep.subr.bf16.mxu0 %v3298_v43 }
 0x246   :  { %p3356_p3 = por %p3355_p2, %p3354_p1 }
 0x247   :  { %2837 = vmatpush3.bf16.msra.mxu1 %v3299_v11 }
 0x248   :  { %2859 = vmatpush3.bf16.msra.mxu0 %v3300_v46  ;;  %2838 = vmatprep.subr.bf16.mxu1 %v3301_v12  ;;  %p3357_p4 = pnand %p3356_p3, %p3350_p0 }
 0x249   :  { %2860 = vmatprep.subr.bf16.mxu0 %v3302_v47 }
 0x24b   :  { %2839 = vmatpush3.bf16.msra.mxu1 %v3303_v48  ;;  %v973_v48 = vsub.s32 4, %v3664_v21 }
 0x24c   :  { %2861 = vmatpush3.bf16.msra.mxu0 %v3304_v49  ;;  %2840 = vmatprep.subr.bf16.mxu1 %v3305_v50  ;;  %v977_v49 = vsub.s32 5, %v3664_v21 }
 0x24d   :  { %2862 = vmatprep.subr.bf16.mxu0 %v3306_v51  ;;  %v974_v50 = vrot.slane %v4381_v2, %v973_v48 }
 0x24e   :  { %v978_v51 = vrot.slane %v4381_v2, %v977_v49 }
 0x24f   :  { %2841 = vmatpush3.bf16.msra.mxu1 %v3307_v52 }
 0x250   :  { %2863 = vmatpush3.bf16.msra.mxu0 %v3308_v53  ;;  %2842 = vmatprep.subr.bf16.mxu1 %v3309_v54 }
 0x251   :  { %2864 = vmatprep.subr.bf16.mxu0 %v3310_v55 }
 0x253   :  { %2843 = vmatpush3.bf16.msra.mxu1 %v3311_v56 }
 0x254   :  { %2865 = vmatpush3.bf16.msra.mxu0 %v3312_v57  ;;  %2844 = vmatprep.subr.bf16.mxu1 %v3313_v58 }
 0x255   :  { %2866 = vmatprep.subr.bf16.mxu0 %v3314_v59 }
 0x257   :  { %2845 = vmatpush3.bf16.msra.mxu1 %v3315_v60 }
 0x258   :  { %2867 = vmatpush3.bf16.msra.mxu0 %v3316_v61  ;;  %2846 = vmatprep.subr.bf16.mxu1 %v3317_v62 }
 0x259   :  { %2868 = vmatprep.subr.bf16.mxu0 %v3318_v63 }
 0x25b   :  { %2847 = vmatpush3.bf16.msra.mxu1 %v3319_v0 }
 0x25c   :  { %2869 = vmatpush3.bf16.msra.mxu0 %v3320_v1 }
 0x25e   :  { %2433 = vmatmul.mubr.bf16.vlgmr.msra.gmra.mxu1 %v3890_v15 }
 0x25f   :  { %2474 = vmatmul.mubr.bf16.vlgmr.msra.gmra.mxu0 %v3892_v16 }
 0x27e   :  { %v2176_v5 = vpop.f32.mrf.mxu1  ;;  %v2219_v6 = vpop.f32.mrf.mxu0 }
 0x27f   :  { %v2177_v7 = vadd.f32 %v2176_v5, %v958_v3 }
 0x280   :  { %v2178_v8 = vpop.f32.mrf.mxu1  ;;  %v2221_v9 = vpop.f32.mrf.mxu0 }
 0x281   :  { %v2220_v10 = vadd.f32 %v2219_v6, %v2177_v7  ;;  %v2179_v15 = vadd.f32 %v2178_v8, %v962_v4 }
 0x282   :  { %v2180_v13 = vpop.f32.mrf.mxu1  ;;  %v2223_v16 = vpop.f32.mrf.mxu0 }
 0x283   :  { %3321 = vtanh.f32 %v2220_v10  ;;  %v2222_v14 = vadd.f32 %v2221_v9, %v2179_v15  ;;  %v2181_v17 = vadd.f32 %v2180_v13, %v958_v3  ;;  %v981_v9 = vsub.s32 6, %v3664_v21 }
 0x284   :  { %v2182_v18 = vpop.f32.mrf.mxu1  ;;  %v2225_v23 = vpop.f32.mrf.mxu0 }
 0x285   :  { %3323 = vtanh.f32 %v2222_v14  ;;  %v2224_v19 = vadd.f32 %v2223_v16, %v2181_v17  ;;  %v2183_v20 = vadd.f32 %v2182_v18, %v962_v4  ;;  %v982_v13 = vrot.slane %v4381_v2, %v981_v9 }
 0x287   :  { %3325 = vtanh.f32 %v2224_v19  ;;  %v2226_v24 = vadd.f32 %v2225_v23, %v2183_v20 }
 0x289   :  { %3327 = vtanh.f32 %v2226_v24 }
 0x290   :  { %v3322_v22 = vpop.eup %3321 }
 0x291   :  { %2496 = vst [vmem:[#allocation2] sm:$0xff] %v3322_v22 }
 0x292   :  { %v3324_v25 = vpop.eup %3323 }
 0x293   :  { %2497 = vst [vmem:[#allocation2 + $0x8] sm:$0xff] %v3324_v25 }
 0x294   :  { %v3326_v26 = vpop.eup %3325 }
 0x295   :  { %2504 = vst [vmem:[#allocation2 + $0x38] sm:$0xff] %v3326_v26 }
 0x296   :  { %v3328_v27 = vpop.eup %3327 }
 0x297   :  { %2505 = vst [vmem:[#allocation2 + $0x40] sm:$0xff] %v3328_v27 }
 0x2be   :  { %v2262_v30 = vpop.f32.mrf.mxu1  ;;  %v2305_v31 = vpop.f32.mrf.mxu0 }
 0x2bf   :  { %v2263_v32 = vadd.f32 %v2262_v30, %v966_v28 }
 0x2c0   :  { %v2264_v33 = vpop.f32.mrf.mxu1  ;;  %v2307_v34 = vpop.f32.mrf.mxu0 }
 0x2c1   :  { %v2306_v35 = vadd.f32 %v2305_v31, %v2263_v32  ;;  %v2265_v36 = vadd.f32 %v2264_v33, %v970_v29 }
 0x2c2   :  { %v2266_v37 = vpop.f32.mrf.mxu1  ;;  %v2309_v38 = vpop.f32.mrf.mxu0 }
 0x2c3   :  { %3329 = vtanh.f32 %v2306_v35  ;;  %v2308_v39 = vadd.f32 %v2307_v34, %v2265_v36  ;;  %v2267_v40 = vadd.f32 %v2266_v37, %v966_v28 }
 0x2c4   :  { %v2268_v41 = vpop.f32.mrf.mxu1  ;;  %v2311_v43 = vpop.f32.mrf.mxu0 }
 0x2c5   :  { %3331 = vtanh.f32 %v2308_v39  ;;  %v2310_v42 = vadd.f32 %v2309_v38, %v2267_v40  ;;  %v2269_v45 = vadd.f32 %v2268_v41, %v970_v29 }
 0x2c7   :  { %3333 = vtanh.f32 %v2310_v42  ;;  %v2312_v11 = vadd.f32 %v2311_v43, %v2269_v45 }
 0x2c9   :  { %3335 = vtanh.f32 %v2312_v11 }
 0x2d0   :  { %v3330_v44 = vpop.eup %3329 }
 0x2d1   :  { %2498 = vst [vmem:[#allocation2 + $0x10] sm:$0xff] %v3330_v44 }
 0x2d2   :  { %v3332_v46 = vpop.eup %3331 }
 0x2d3   :  { %2499 = vst [vmem:[#allocation2 + $0x18] sm:$0xff] %v3332_v46 }
 0x2d4   :  { %v3334_v12 = vpop.eup %3333 }
 0x2d5   :  { %2506 = vst [vmem:[#allocation2 + $0x48] sm:$0xff] %v3334_v12 }
 0x2d6   :  { %v3336_v47 = vpop.eup %3335 }
 0x2d7   :  { %2507 = vst [vmem:[#allocation2 + $0x50] sm:$0xff] %v3336_v47 }
 0x2fe   :  { %v2348_v52 = vpop.f32.mrf.mxu1 }
 0x2ff   :  { %v2349_v53 = vadd.f32 %v2348_v52, %v974_v50  ;;  %v2391_v54 = vpop.f32.mrf.mxu0 }
 0x300   :  { %v2350_v55 = vpop.f32.mrf.mxu1 }
 0x301   :  { %v2392_v56 = vadd.f32 %v2391_v54, %v2349_v53  ;;  %v2351_v57 = vadd.f32 %v2350_v55, %v978_v51  ;;  %v2393_v58 = vpop.f32.mrf.mxu0 }
 0x302   :  { %v2352_v59 = vpop.f32.mrf.mxu1 }
 0x303   :  { %3337 = vtanh.f32 %v2392_v56  ;;  %v2394_v60 = vadd.f32 %v2393_v58, %v2351_v57  ;;  %v2353_v61 = vadd.f32 %v2352_v59, %v974_v50  ;;  %v2395_v62 = vpop.f32.mrf.mxu0 }
 0x304   :  { %v2354_v63 = vpop.f32.mrf.mxu1 }
 0x305   :  { %3339 = vtanh.f32 %v2394_v60  ;;  %v2396_v0 = vadd.f32 %v2395_v62, %v2353_v61  ;;  %v2355_v1 = vadd.f32 %v2354_v63, %v978_v51  ;;  %v2397_v3 = vpop.f32.mrf.mxu0 }
 0x307   :  { %3341 = vtanh.f32 %v2396_v0  ;;  %v2398_v4 = vadd.f32 %v2397_v3, %v2355_v1 }
 0x309   :  { %3343 = vtanh.f32 %v2398_v4 }
 0x310   :  { %v3338_v5 = vpop.eup %3337 }
 0x311   :  { %2500 = vst [vmem:[#allocation2 + $0x20] sm:$0xff] %v3338_v5 }
 0x312   :  { %v3340_v6 = vpop.eup %3339 }
 0x313   :  { %2501 = vst [vmem:[#allocation2 + $0x28] sm:$0xff] %v3340_v6 }
 0x314   :  { %v3342_v7 = vpop.eup %3341 }
 0x315   :  { %2508 = vst [vmem:[#allocation2 + $0x58] sm:$0xff] %v3342_v7 }
 0x316   :  { %v3344_v8 = vpop.eup %3343 }
 0x317   :  { %2509 = vst [vmem:[#allocation2 + $0x60] sm:$0xff] %v3344_v8 }
 0x31e   :  { %v2848_v10 = vpop.f32.mrf.mxu1 }
 0x31f   :  { %v2870_v15 = vpop.f32.mrf.mxu0 }
 0x320   :  { %v2849_v16 = vpop.f32.mrf.mxu1 }
 0x321   :  { %v2850_v14 = vadd.f32 %v2849_v16, %v2848_v10  ;;  %v2871_v17 = vpop.f32.mrf.mxu0 }
 0x322   :  { %v2851_v18 = vpop.f32.mrf.mxu1  ;;  %v2872_v20 = vadd.f32 %v2871_v17, %v2870_v15 }
 0x323   :  { %v2435_v19 = vadd.f32 %v2850_v14, %v982_v13  ;;  %v2873_v23 = vpop.f32.mrf.mxu0 }
 0x324   :  { %v2852_v24 = vpop.f32.mrf.mxu1 }
 0x325   :  { %v2476_v22 = vadd.f32 %v2872_v20, %v2435_v19  ;;  %v2853_v25 = vadd.f32 %v2852_v24, %v2851_v18  ;;  %v2874_v26 = vpop.f32.mrf.mxu0 }
 0x326   :  { %v2875_v28 = vadd.f32 %v2874_v26, %v2873_v23 }
 0x327   :  { %3345 = vtanh.f32 %v2476_v22  ;;  %v2438_v27 = vadd.f32 %v2853_v25, %v982_v13 }
 0x329   :  { %v2479_v29 = vadd.f32 %v2875_v28, %v2438_v27 }
 0x32b   :  { %3347 = vtanh.f32 %v2479_v29 }
 0x334   :  { %v3346_v21 = vpop.eup %3345 }
 0x335   :  { %2503 = vst.msk [vmem:[#allocation2 + $0x30] sm:$0xff] %vm2502_vm0, %v3346_v21 }
 0x338   :  { %v3348_v2 = vpop.eup %3347 }
 0x339   :  { %2510 = vst.msk [vmem:[#allocation2 + $0x68] sm:$0xff] %vm2502_vm0, %v3348_v2 }
 0x33a   :  { %3360 = shalt.err (!%p3357_p4)
}
 0x33b   :  { %s3373_s24 = smov 896   ;;  %s3374_s25 = smov 56  }
 0x33c   :  { %2522 = dma.vmem_to_hbm [thread:$0]  %s2517_s6, 1792, %s4409_s7, [#allocation3], %s3373_s24, %s3373_s24, %s3374_s25  }
 0x33d   :  { %3369 = dma.done.wait [#allocation3], 1792  }
 0x33e   :  { %3370 = vsyncadd [#allocation3], 4294965504 }
 0x33f   :  { %2526 = vsyncpa [#allocation3], 1 }

</bundles_post_ra>
